<compile_context>
chip_gen: v7x
topology: tpu7x:2x2x1
jax: 0.10.0
libtpu: 0.0.40
codegen_flags: <defaults>
</compile_context>

<pallas_src>
import functools

import jax
import jax.numpy as jnp
from jax.experimental import pallas as pl
from jax.experimental.pallas import tpu as pltpu


# ----------------------------- Pallas kernel --------------------------------

def base_classifier_kernel(patches_ref, wc_ref, bc_ref,
                           w1_ref, b1_ref, w2_ref, b2_ref,
                           out_ref, acc_ref, *, inv_p):
    """Tiled conv-stem matmul + ReLU, GAP accumulation, fused classifier head.

    Grid: (P // TP,)  -- reduction over spatial tiles ("arbitrary").

    patches_ref : (B, TP, KP)  bf16   im2col tile (K zero-padded to KP=128)
    wc_ref      : (KP, F)      bf16   conv stem weight (resident)
    bc_ref      : (1, F)       f32    conv stem bias
    w1_ref      : (F, 512)     bf16   classifier[1].weight.T
    b1_ref      : (1, 512)     f32    classifier[1].bias
    w2_ref      : (512, NCP)   bf16   classifier[4].weight.T, NC padded to 128
    b2_ref      : (1, NCP)     f32    classifier[4].bias, padded to 128
    out_ref     : (B, NCP)     f32    padded logits (written on last step)
    acc_ref     : (B, F)       f32    running GAP sum (VMEM scratch)
    """
    p = pl.program_id(0)

    @pl.when(p == 0)
    def _init():
        acc_ref[...] = jnp.zeros_like(acc_ref)

    B, TP, KP = patches_ref.shape
    F = wc_ref.shape[-1]

    # ---- backbone stand-in: conv (one flat 2D MXU matmul) + bias + ReLU
    patches_2d = patches_ref[...].reshape(B * TP, KP)            # bf16
    conv = jnp.dot(patches_2d, wc_ref[...],
                   preferred_element_type=jnp.float32)           # (B*TP, F) f32
    conv = jnp.maximum(conv + bc_ref[...], 0.0)

    # Accumulate the global-average-pool numerator (sum over spatial tiles).
    acc_ref[...] += conv.reshape(B, TP, F).sum(axis=1)

    # ---- classifier head, once, at the reduction epilogue
    @pl.when(p == pl.num_programs(0) - 1)
    def _finalize():
        feats = (acc_ref[...] * inv_p).astype(jnp.bfloat16)      # GAP -> (B, F)
        # Dropout(p*0.5) is identity in eval mode.
        h = jnp.dot(feats, w1_ref[...],
                    preferred_element_type=jnp.float32) + b1_ref[...]
        h = jnp.maximum(h, 0.0).astype(jnp.bfloat16)             # ReLU(inplace)
        logits = jnp.dot(h, w2_ref[...],
                         preferred_element_type=jnp.float32) + b2_ref[...]
        out_ref[...] = logits.astype(out_ref.dtype)


# ------------------------------- wrappers ------------------------------------

def im2col_3x3_same(x_nchw):
    """NCHW -> (B, H*W, C*9) patches for a 3x3 stride-1 'same' conv."""
    B, C, H, W = x_nchw.shape
    xp = jnp.pad(x_nchw, ((0, 0), (0, 0), (1, 1), (1, 1)))
    taps = []
    for di in range(3):
        for dj in range(3):
            taps.append(xp[:, :, di:di + H, dj:dj + W])          # (B, C, H, W)
    pat = jnp.stack(taps, axis=1)                                # (B, 9, C, H, W)
    pat = pat.reshape(B, 9 * C, H * W)                           # (B, K, P)
    return jnp.transpose(pat, (0, 2, 1))                         # (B, P, K)


def base_classifier_forward(x_nchw, params, *, tile_p=128):
    B, C, H, W = x_nchw.shape
    P = H * W
    num_classes = params['b2'].shape[-1]
    F = params['wc'].shape[-1]
    HID = params['w1'].shape[-1]

    tile_p = min(tile_p, P)
    assert P % tile_p == 0 and tile_p % 8 == 0, "spatial tile must divide P and be sublane-aligned"

    # im2col + pad contraction dim K to a full 128-lane width; bf16 MXU operands.
    patches = im2col_3x3_same(x_nchw.astype(jnp.float32))        # (B, P, K) f32
    K = patches.shape[-1]
    KP = ((K + 127) // 128) * 128
    patches = jnp.pad(patches, ((0, 0), (0, 0), (0, KP - K))).astype(jnp.bfloat16)

    wc = jnp.pad(params['wc'], ((0, KP - K), (0, 0))).astype(jnp.bfloat16)   # (KP, F)
    bc = params['bc'].astype(jnp.float32)                                    # (1, F)
    w1 = params['w1'].astype(jnp.bfloat16)                                   # (F, HID)
    b1 = params['b1'].astype(jnp.float32)                                    # (1, HID)

    # Lane-dense padded output: pad num_classes -> NCP = 128.
    NCP = ((num_classes + 127) // 128) * 128
    w2 = jnp.pad(params['w2'], ((0, 0), (0, NCP - num_classes))).astype(jnp.bfloat16)
    b2 = jnp.pad(params['b2'], ((0, 0), (0, NCP - num_classes))).astype(jnp.float32)

    grid = (P // tile_p,)
    const = lambda p: (0, 0)   # weights / biases / output stay VMEM-resident

    flops = 2 * B * P * KP * F + 2 * B * F * HID + 2 * B * HID * NCP
    bytes_accessed = (patches.size * 2 + wc.size * 2 + w1.size * 2 + w2.size * 2
                      + bc.size * 4 + b1.size * 4 + b2.size * 4 + B * NCP * 4)

    fn = pl.pallas_call(
        functools.partial(base_classifier_kernel, inv_p=1.0 / float(P)),
        out_shape=jax.ShapeDtypeStruct((B, NCP), jnp.float32),
        grid=grid,
        in_specs=[
            pl.BlockSpec((B, tile_p, KP), lambda p: (0, p, 0)),  # streamed patches
            pl.BlockSpec((KP, F), const),
            pl.BlockSpec((1, F), const),
            pl.BlockSpec((F, HID), const),
            pl.BlockSpec((1, HID), const),
            pl.BlockSpec((HID, NCP), const),
            pl.BlockSpec((1, NCP), const),
        ],
        out_specs=pl.BlockSpec((B, NCP), const),
        scratch_shapes=[pltpu.VMEM((B, F), jnp.float32)],        # GAP accumulator
        compiler_params=pltpu.CompilerParams(
            dimension_semantics=("arbitrary",)),                 # P is a reduction axis
        cost_estimate=pl.CostEstimate(flops=flops, transcendentals=0,
                                      bytes_accessed=bytes_accessed),
    )
    logits_padded = fn(patches, wc, bc, w1, b1, w2, b2)
    return logits_padded[:, :num_classes]


def reference_forward(x_nchw, params):
    """Pure-JAX reference mirroring the kernel's bf16 operand casts."""
    bf = lambda a: a.astype(jnp.bfloat16).astype(jnp.float32)
    patches = im2col_3x3_same(x_nchw.astype(jnp.float32))
    conv = jnp.einsum('bpk,kf->bpf', bf(patches), bf(params['wc']),
                      preferred_element_type=jnp.float32) + params['bc']
    feats = jnp.mean(jnp.maximum(conv, 0.0), axis=1)
    h = jnp.dot(bf(feats), bf(params['w1']),
                preferred_element_type=jnp.float32) + params['b1']
    h = jnp.maximum(h, 0.0)
    return jnp.dot(bf(h), bf(params['w2']),
                   preferred_element_type=jnp.float32) + params['b2']


def init_params(key, c_in=3, num_features=512, hidden=512, num_classes=10):
    """Deterministic init.  Classifier follows _initialise_weights():
       kaiming_normal_(mode='fan_out', nonlinearity='relu'), bias = 0."""
    k_c, k_1, k_2 = jax.random.split(key, 3)
    K = c_in * 3 * 3

    # backbone stand-in conv stem (arbitrary deterministic init)
    wc = jax.random.normal(k_c, (K, num_features), jnp.float32) * (2.0 / K) ** 0.5
    bc = jnp.zeros((1, num_features), jnp.float32)

    # Linear(num_features, hidden): weight (hidden, num_features), fan_out = hidden
    std1 = (2.0 / hidden) ** 0.5
    w1 = (jax.random.normal(k_1, (hidden, num_features), jnp.float32) * std1).T
    b1 = jnp.zeros((1, hidden), jnp.float32)

    # Linear(hidden, num_classes): weight (num_classes, hidden), fan_out = num_classes
    std2 = (2.0 / num_classes) ** 0.5
    w2 = (jax.random.normal(k_2, (num_classes, hidden), jnp.float32) * std2).T
    b2 = jnp.zeros((1, num_classes), jnp.float32)

    return dict(wc=wc, bc=bc, w1=w1, b1=b1, w2=w2, b2=b2)


# --------------------------------- main --------------------------------------

if __name__ == "__main__":
    key = jax.random.PRNGKey(0)
    k_x, k_p = jax.random.split(key)

    B, C, H, W = 2, 3, 16, 16                # small NCHW image input
    num_classes = 10
    x = jax.random.normal(k_x, (B, C, H, W), jnp.float32)

    params = init_params(k_p, c_in=C, num_features=512,
                         hidden=512, num_classes=num_classes)

    logits = base_classifier_forward(x, params)
    logits = jax.block_until_ready(logits)

    assert logits.shape == (B, num_classes)
    assert jnp.isfinite(logits).all()

    ref = reference_forward(x, params)
    max_err = float(jnp.max(jnp.abs(logits - ref)))
    assert max_err < 5e-2, f"kernel/reference mismatch: {max_err}"

    print("KERNEL_OK")
</pallas_src>

<mosaic_0001>
module attributes {stable_mosaic.version = 11 : i64} {
  func.func @base_classifier_kernel(%arg0: i32, %arg1: memref<2x128x128xbf16, #tpu.memory_space<vmem>>, %arg2: memref<128x512xbf16, #tpu.memory_space<vmem>>, %arg3: memref<1x512xf32, #tpu.memory_space<vmem>>, %arg4: memref<512x512xbf16, #tpu.memory_space<vmem>>, %arg5: memref<1x512xf32, #tpu.memory_space<vmem>>, %arg6: memref<512x128xbf16, #tpu.memory_space<vmem>>, %arg7: memref<1x128xf32, #tpu.memory_space<vmem>>, %arg8: memref<2x128xf32, #tpu.memory_space<vmem>>, %arg9: memref<2x512xf32, #tpu.memory_space<vmem>>) attributes {dimension_semantics = [#tpu.dimension_semantics<arbitrary>], iteration_bounds = array<i64: 2>, scalar_prefetch = 0 : i64, scratch_operands = 1 : i64, tpu.core_type = #tpu.core_type<tc>, window_params = [{transform_indices = @transform_0, window_bounds = array<i64: 2, 128, 128>}, {pipeline_mode = #tpu.pipeline_mode<synchronous>, transform_indices = @transform_1, window_bounds = array<i64: 128, 512>}, {pipeline_mode = #tpu.pipeline_mode<synchronous>, transform_indices = @transform_2, window_bounds = array<i64: 1, 512>}, {pipeline_mode = #tpu.pipeline_mode<synchronous>, transform_indices = @transform_3, window_bounds = array<i64: 512, 512>}, {pipeline_mode = #tpu.pipeline_mode<synchronous>, transform_indices = @transform_4, window_bounds = array<i64: 1, 512>}, {pipeline_mode = #tpu.pipeline_mode<synchronous>, transform_indices = @transform_5, window_bounds = array<i64: 512, 128>}, {pipeline_mode = #tpu.pipeline_mode<synchronous>, transform_indices = @transform_6, window_bounds = array<i64: 1, 128>}, {pipeline_mode = #tpu.pipeline_mode<synchronous>, transform_indices = @transform_7, window_bounds = array<i64: 2, 128>}]} {
    %c0_i32 = arith.constant 0 : i32
    %0 = arith.cmpi eq, %arg0, %c0_i32 : i32
    %1 = arith.extui %0 : i1 to i32
    %c0_i32_0 = arith.constant 0 : i32
    %2 = arith.cmpi ne, %1, %c0_i32_0 : i32
    scf.if %2 {
      %cst_14 = arith.constant 0.000000e+00 : f32
      %20 = vector.broadcast %cst_14 : f32 to vector<2x512xf32>
      %c0_15 = arith.constant 0 : index
      %c0_16 = arith.constant 0 : index
      %21 = vector.load %arg9[%c0_15, %c0_16] : memref<2x512xf32, #tpu.memory_space<vmem>>, vector<2x512xf32>
      tpu.vector_store %arg9[%c0_15, %c0_16], %20 {strides = array<i32>} : memref<2x512xf32, #tpu.memory_space<vmem>>, vector<2x512xf32>,
    } else {
    }
    %c0 = arith.constant 0 : index
    %c0_1 = arith.constant 0 : index
    %c0_2 = arith.constant 0 : index
    %3 = vector.load %arg1[%c0, %c0_1, %c0_2] : memref<2x128x128xbf16, #tpu.memory_space<vmem>>, vector<2x128x128xbf16>
    %4 = vector.shape_cast %3 : vector<2x128x128xbf16> to vector<256x128xbf16>
    %c0_3 = arith.constant 0 : index
    %c0_4 = arith.constant 0 : index
    %5 = vector.load %arg2[%c0_3, %c0_4] : memref<128x512xbf16, #tpu.memory_space<vmem>>, vector<128x512xbf16>
    %cst = arith.constant dense<0.000000e+00> : vector<256x512xf32>
    %6 = tpu.matmul %4, %5, %cst {dimension_numbers = #tpu.dot_dimension_numbers<[1], [0], [0], [1], [0, 0, 1, 1], [], []>} : vector<256x128xbf16>, vector<128x512xbf16>, vector<256x512xf32> -> vector<256x512xf32>
    %c0_5 = arith.constant 0 : index
    %c0_6 = arith.constant 0 : index
    %7 = vector.load %arg3[%c0_5, %c0_6] : memref<1x512xf32, #tpu.memory_space<vmem>>, vector<1x512xf32>
    %8 = vector.broadcast %7 : vector<1x512xf32> to vector<256x512xf32>
    %9 = arith.addf %6, %8 : vector<256x512xf32>
    %cst_7 = arith.constant 0.000000e+00 : f32
    %10 = vector.broadcast %cst_7 : f32 to vector<256x512xf32>
    %11 = arith.maximumf %9, %10 : vector<256x512xf32>
    %c0_8 = arith.constant 0 : index
    %c0_9 = arith.constant 0 : index
    %12 = vector.load %arg9[%c0_8, %c0_9] : memref<2x512xf32, #tpu.memory_space<vmem>>, vector<2x512xf32>
    %13 = vector.shape_cast %11 : vector<256x512xf32> to vector<2x128x512xf32>
    %cst_10 = arith.constant dense<0.000000e+00> : vector<2x512xf32>
    %14 = vector.multi_reduction <add>, %13, %cst_10 [1] : vector<2x128x512xf32> to vector<2x512xf32>
    %15 = arith.addf %12, %14 : vector<2x512xf32>
    %c0_11 = arith.constant 0 : index
    %c0_12 = arith.constant 0 : index
    %16 = vector.load %arg9[%c0_11, %c0_12] : memref<2x512xf32, #tpu.memory_space<vmem>>, vector<2x512xf32>
    tpu.vector_store %arg9[%c0_11, %c0_12], %15 {strides = array<i32>} : memref<2x512xf32, #tpu.memory_space<vmem>>, vector<2x512xf32>,
    %c1_i32 = arith.constant 1 : i32
    %17 = arith.cmpi eq, %arg0, %c1_i32 : i32
    %18 = arith.extui %17 : i1 to i32
    %c0_i32_13 = arith.constant 0 : i32
    %19 = arith.cmpi ne, %18, %c0_i32_13 : i32
    scf.if %19 {
      %c0_14 = arith.constant 0 : index
      %c0_15 = arith.constant 0 : index
      %20 = vector.load %arg9[%c0_14, %c0_15] : memref<2x512xf32, #tpu.memory_space<vmem>>, vector<2x512xf32>
      %cst_16 = arith.constant 3.906250e-03 : f32
      %21 = vector.broadcast %cst_16 : f32 to vector<2x512xf32>
      %22 = arith.mulf %20, %21 : vector<2x512xf32>
      %23 = arith.truncf %22 : vector<2x512xf32> to vector<2x512xbf16>
      %c0_17 = arith.constant 0 : index
      %c0_18 = arith.constant 0 : index
      %24 = vector.load %arg4[%c0_17, %c0_18] : memref<512x512xbf16, #tpu.memory_space<vmem>>, vector<512x512xbf16>
      %cst_19 = arith.constant dense<0.000000e+00> : vector<2x512xf32>
      %25 = tpu.matmul %23, %24, %cst_19 {dimension_numbers = #tpu.dot_dimension_numbers<[1], [0], [0], [1], [0, 0, 1, 1], [], []>} : vector<2x512xbf16>, vector<512x512xbf16>, vector<2x512xf32> -> vector<2x512xf32>
      %c0_20 = arith.constant 0 : index
      %c0_21 = arith.constant 0 : index
      %26 = vector.load %arg5[%c0_20, %c0_21] : memref<1x512xf32, #tpu.memory_space<vmem>>, vector<1x512xf32>
      %27 = vector.broadcast %26 : vector<1x512xf32> to vector<2x512xf32>
      %28 = arith.addf %25, %27 : vector<2x512xf32>
      %cst_22 = arith.constant 0.000000e+00 : f32
      %29 = vector.broadcast %cst_22 : f32 to vector<2x512xf32>
      %30 = arith.maximumf %28, %29 : vector<2x512xf32>
      %31 = arith.truncf %30 : vector<2x512xf32> to vector<2x512xbf16>
      %c0_23 = arith.constant 0 : index
      %c0_24 = arith.constant 0 : index
      %32 = vector.load %arg6[%c0_23, %c0_24] : memref<512x128xbf16, #tpu.memory_space<vmem>>, vector<512x128xbf16>
      %cst_25 = arith.constant dense<0.000000e+00> : vector<2x128xf32>
      %33 = tpu.matmul %31, %32, %cst_25 {dimension_numbers = #tpu.dot_dimension_numbers<[1], [0], [0], [1], [0, 0, 1, 1], [], []>} : vector<2x512xbf16>, vector<512x128xbf16>, vector<2x128xf32> -> vector<2x128xf32>
      %c0_26 = arith.constant 0 : index
      %c0_27 = arith.constant 0 : index
      %34 = vector.load %arg7[%c0_26, %c0_27] : memref<1x128xf32, #tpu.memory_space<vmem>>, vector<1x128xf32>
      %35 = vector.broadcast %34 : vector<1x128xf32> to vector<2x128xf32>
      %36 = arith.addf %33, %35 : vector<2x128xf32>
      %c0_28 = arith.constant 0 : index
      %c0_29 = arith.constant 0 : index
      %37 = vector.load %arg8[%c0_28, %c0_29] : memref<2x128xf32, #tpu.memory_space<vmem>>, vector<2x128xf32>
      tpu.vector_store %arg8[%c0_28, %c0_29], %36 {strides = array<i32>} : memref<2x128xf32, #tpu.memory_space<vmem>>, vector<2x128xf32>,
    } else {
    }
    return
  }
  func.func @transform_0(%arg0: i32) -> (i32, i32, i32) {
    %c0_i32 = arith.constant 0 : i32
    %c0_i32_0 = arith.constant 0 : i32
    %c0_i32_1 = arith.constant 0 : i32
    return %c0_i32, %arg0, %c0_i32_0 : i32, i32, i32
  }
  func.func @transform_1(%arg0: i32) -> (i32, i32) {
    %c0_i32 = arith.constant 0 : i32
    %c0_i32_0 = arith.constant 0 : i32
    %c0_i32_1 = arith.constant 0 : i32
    return %c0_i32, %c0_i32_0 : i32, i32
  }
  func.func @transform_2(%arg0: i32) -> (i32, i32) {
    %c0_i32 = arith.constant 0 : i32
    %c0_i32_0 = arith.constant 0 : i32
    %c0_i32_1 = arith.constant 0 : i32
    return %c0_i32, %c0_i32_0 : i32, i32
  }
  func.func @transform_3(%arg0: i32) -> (i32, i32) {
    %c0_i32 = arith.constant 0 : i32
    %c0_i32_0 = arith.constant 0 : i32
    %c0_i32_1 = arith.constant 0 : i32
    return %c0_i32, %c0_i32_0 : i32, i32
  }
  func.func @transform_4(%arg0: i32) -> (i32, i32) {
    %c0_i32 = arith.constant 0 : i32
    %c0_i32_0 = arith.constant 0 : i32
    %c0_i32_1 = arith.constant 0 : i32
    return %c0_i32, %c0_i32_0 : i32, i32
  }
  func.func @transform_5(%arg0: i32) -> (i32, i32) {
    %c0_i32 = arith.constant 0 : i32
    %c0_i32_0 = arith.constant 0 : i32
    %c0_i32_1 = arith.constant 0 : i32
    return %c0_i32, %c0_i32_0 : i32, i32
  }
  func.func @transform_6(%arg0: i32) -> (i32, i32) {
    %c0_i32 = arith.constant 0 : i32
    %c0_i32_0 = arith.constant 0 : i32
    %c0_i32_1 = arith.constant 0 : i32
    return %c0_i32, %c0_i32_0 : i32, i32
  }
  func.func @transform_7(%arg0: i32) -> (i32, i32) {
    %c0_i32 = arith.constant 0 : i32
    %c0_i32_0 = arith.constant 0 : i32
    %c0_i32_1 = arith.constant 0 : i32
    return %c0_i32, %c0_i32_0 : i32, i32
  }
}

</mosaic_0001>

<bundles_post_ra>
// kernel: tpu_custom_call.1
= control target key start
LH: loop header
LB: loop body
LE: loop exit
PB: predicated region body
PF: predicated region fallthrough
CT: control target
= control target key end

     0   :  { %12 = vsyncpa [#allocation4], 0  ;;  %s4205_s0 = inlined_call_operand.hbm [shape: bf16[2,256,128], index: 0, kind: input, shape index: {}]   ;;  %s4206_s1 = inlined_call_operand.hbm [shape: bf16[128,512], index: 1, kind: input, shape index: {}]   ;;  %s4207_s2 = inlined_call_operand.vmem [shape: f32[1,512], index: 2, kind: input, shape index: {}]   ;;  %s4208_s3 = inlined_call_operand.hbm [shape: bf16[512,512], index: 3, kind: input, shape index: {}]   ;;  %s4209_s4 = inlined_call_operand.vmem [shape: f32[1,512], index: 4, kind: input, shape index: {}]   ;;  %s4210_s5 = inlined_call_operand.hbm [shape: bf16[512,128], index: 5, kind: input, shape index: {}]   ;;  %s4211_s6 = inlined_call_operand.vmem [shape: f32[1,128], index: 6, kind: input, shape index: {}]   ;;  %s4212_s7 = inlined_call_operand.hbm [shape: f32[2,128], index: 7, kind: output, shape index: {}]  }
   0x1   :  { %14 = vsyncpa [#allocation4 + $0x1], 0 }
   0x2   :  { %15 = vsyncpa [#allocation7], 0 }
   0x3   :  { %16 = vsyncpa [#allocation10], 0 }
   0x4   :  { %17 = vsyncpa [#allocation5], 0  ;;  %s3751_s24 = smov 0   ;;  %s3753_s25 = smov 0  }
   0x5   :  { %s3755_s26 = smov 0   ;;  %s3757_s27 = smov 0  }
   0x6 LB: > { %s3770_s28 = sadd.s32 4294967295, %s3692_s27   ;;  %s3773_s29 = sadd.s32 1, %s3692_s27   ;;  %s3692_s27 = sphi %s3757_s27, %s4234_s27   ;;  %s3688_s26 = sphi %s3755_s26, %s4238_s26   ;;  %s3684_s25 = sphi %s3753_s25, %s4237_s25   ;;  %s3680_s24 = sphi %s3751_s24, %s4236_s24  }
   0x7   : > { %4219 = sst [smem:[#allocation19_spill]] %s3773_s29  ;;  %s27_s30 = ssub.s32 %s3692_s27, %s3773_s29 }
   0x8   : > { %s30_s8 = sadd.s32 1, %s3688_s26  ;;  %p28_p0 = scmp.eq.s32.totalorder %s27_s30, 0 }
   0x9   : > { %p37_p1 = scmp.ne.s32.totalorder %s3688_s26, %s3684_s25  ;;  %p38_p2 = scmp.eq.s32.totalorder %s3692_s27, 0 }
   0xa   : > { %p43_p3 = scmp.ne.s32.totalorder %s3684_s25, %s3680_s24  ;;  %p4213_p5 = scmp.eq.s32.totalorder %s3770_s28, 0 }
   0xb   : > { %s3783_s9 = scalar_select %p28_p0, %s3688_s26, %s30_s8  }
   0xc   : > { %p3785_p4 = por %p38_p2, %p37_p1  ;;  %p2869_p6 = scmp.ge.s32.totalorder %s3692_s27, 1 }
   0xd   : > { %4220 = sst [smem:[#allocation20_spill]] %s3783_s9  ;;  %p201_p7 = scmp.lt.s32.totalorder %s3692_s27, 3 }
   0xe   : > { %s4221_s10 = scalar_select %p3785_p4, 1, 0 }
   0xf   : > { %p3794_p8 = por %p4213_p5, %p43_p3  ;;  %p3799_p10 = pnand %p2869_p6, %p201_p7 }
  0x10   : > { %s3694_s13 = smov [#allocation6]   ;;  %s3695_s16 = smov [#allocation8]  }
  0x11   : > { %s4222_s11 = scalar_select %p3794_p8, 1, 0 }
  0x12   : > { %s4223_s12 = scalar_select %p3799_p10, 1, 0 }
  0x13   : > { %s213_s14 = sshll.u32 %s3694_s13, 4  ;;  %p3181_p11 = pneg %p3799_p10  ;;  %s3805_s14 = int_to_ptr.vmem [resolvable:$true] %s213_s14 }
  0x14   : > { %s229_s17 = sshll.u32 %s3695_s16, 4  ;;  %s3696_s18 = smov [#allocation9]   ;;  %s3813_s17 = int_to_ptr.vmem [resolvable:$true] %s229_s17 }
  0x15   : > { %p3809_p12 = pnand %p3181_p11, %p4213_p5  ;;  %s3815_s19 = sshll.u32 %s3696_s18, 4  ;;  %s246_s19 = int_to_ptr.vmem [resolvable:$true] %s3815_s19 }
  0x16   : > { %s3536_s22 = scalar_lea.hbm %s4206_s1, 4096 }
  0x17   : > { %p3537_p13 = scmp.ne.s32.totalorder %s4206_s1, %s3536_s22  ;;  %p3825_p0 = pneg %p3809_p12 }
  0x18   : > { %p3543_p3 = scmp.lt.u32.totalorder %s3536_s22, %s4206_s1 }
  0x19   : > { %p3539_p1 = pnand %p3825_p0, %p3537_p13 }
  0x1b   : > { %p3540_p2 = pneg %p3539_p1 }
  0x1d   : > { %p3545_p6 = pnand %p3543_p3, %p3540_p2 }
  0x1f   : > { %3548 = shalt.err (!%p3545_p6)
}
  0x20   : > { %s3549_s16 = scalar_lea.vmem %s3805_s14, 4096  ;;  %p3557_p5 = scmp.lt.s32.totalorder %s3805_s14, %s3805_s14 }
  0x21   : > { %p3550_p7 = scmp.ne.s32.totalorder %s3805_s14, %s3549_s16  ;;  %p3558_p8 = scmp.lt.s32.totalorder %s3549_s16, %s3549_s16 }
  0x23   : > { %p3552_p11 = pnand %p3550_p7, %p3825_p0  ;;  %p3559_p13 = por %p3558_p8, %p3557_p5 }
  0x25   : > { %p3553_p9 = pneg %p3552_p11 }
  0x27   : > { %p3560_p1 = pnand %p3559_p13, %p3553_p9 }
  0x29   : > { %3563 = shalt.err (!%p3560_p1)
}
  0x2a   : > { %s3697_s18 = smov 256   ;;  %s3698_s20 = smov 16  }
  0x2b   : > { %3184 = dma.hbm_to_vmem [thread:$0]  (!%p3809_p12), %s4206_s1, 4096, %s3805_s14, [#allocation7], %s3697_s18, %s3697_s18, %s3698_s20  }
  0x2c   : > { %s3564_s8 = scalar_lea.hbm %s4208_s3, 16384 }
  0x2d   : > { %p3565_p5 = scmp.ne.s32.totalorder %s4208_s3, %s3564_s8  ;;  %p3571_p2 = scmp.lt.u32.totalorder %s3564_s8, %s4208_s3 }
  0x2f   : > { %p3567_p8 = pnand %p3565_p5, %p3825_p0 }
  0x31   : > { %p3568_p9 = pneg %p3567_p8 }
  0x33   : > { %p3573_p3 = pnand %p3571_p2, %p3568_p9 }
  0x35   : > { %3576 = shalt.err (!%p3573_p3)
}
  0x36   : > { %s3577_s14 = scalar_lea.vmem %s3813_s17, 16384  ;;  %p3585_p13 = scmp.lt.s32.totalorder %s3813_s17, %s3813_s17 }
  0x37   : > { %p3578_p6 = scmp.ne.s32.totalorder %s3813_s17, %s3577_s14  ;;  %p3586_p1 = scmp.lt.s32.totalorder %s3577_s14, %s3577_s14 }
  0x39   : > { %p3580_p7 = pnand %p3578_p6, %p3825_p0  ;;  %p3587_p5 = por %p3586_p1, %p3585_p13 }
  0x3b   : > { %p3581_p11 = pneg %p3580_p7 }
  0x3d   : > { %p3588_p8 = pnand %p3587_p5, %p3581_p11 }
  0x3f   : > { %3591 = shalt.err (!%p3588_p8)
}
  0x40   : > { %3187 = dma.hbm_to_vmem [thread:$0]  (!%p3809_p12), %s4208_s3, 16384, %s3813_s17, [#allocation7], %s3697_s18, %s3697_s18, %s3698_s20  }
  0x41   : > { %s3592_s23 = scalar_lea.hbm %s4210_s5, 4096 }
  0x42   : > { %p3593_p9 = scmp.ne.s32.totalorder %s4210_s5, %s3592_s23  ;;  %p3599_p6 = scmp.lt.u32.totalorder %s3592_s23, %s4210_s5 }
  0x44   : > { %p3595_p2 = pnand %p3593_p9, %p3825_p0 }
  0x46   : > { %p3596_p3 = pneg %p3595_p2 }
  0x48   : > { %p3601_p7 = pnand %p3599_p6, %p3596_p3 }
  0x4a   : > { %3604 = shalt.err (!%p3601_p7)
}
  0x4b   : > { %s3605_s14 = scalar_lea.vmem %s246_s19, 4096  ;;  %p3613_p5 = scmp.lt.s32.totalorder %s246_s19, %s246_s19 }
  0x4c   : > { %p3606_p11 = scmp.ne.s32.totalorder %s246_s19, %s3605_s14  ;;  %p3614_p8 = scmp.lt.s32.totalorder %s3605_s14, %s3605_s14 }
  0x4e   : > { %p3608_p13 = pnand %p3606_p11, %p3825_p0  ;;  %p3615_p10 = por %p3614_p8, %p3613_p5 }
  0x50   : > { %p3609_p1 = pneg %p3608_p13 }
  0x52   : > { %p3616_p4 = pnand %p3615_p10, %p3609_p1 }
  0x54   : > { %3619 = shalt.err (!%p3616_p4)
}
  0x55   : > { %s3699_s17 = smov 64   ;;  %s3700_s18 = smov 4  }
  0x56   : > { %3190 = dma.hbm_to_vmem [thread:$0]  (!%p3809_p12), %s4210_s5, 4096, %s246_s19, [#allocation10], %s3699_s17, %s3699_s17, %s3700_s18  }
  0x57   : > { %p2873_p9 = scmp.ge.s32.totalorder %s3692_s27, 2 }
  0x59   : > { %258 = sbr.rel (%p2873_p9) target bundleno = 111 (0x6f), region = 40 }
  0x60   : > { %s262_s30 = sand.u32 1, %s3688_s26   ;;  %s3099_s9 = sshll.u32 %s3692_s27, 10 }
  0x61   : > { %s2874_s21 = sshll.u32 %s262_s30, 7  ;;  %s272_s23 = scalar_lea.hbm %s4205_s0, %s3099_s9 }
  0x62   : > { %p4226_p4 = scmp.ne.s32.totalorder %s4221_s10, 0  ;;  %s266_s24 = scalar_lea.vmem [#allocation3], %s2874_s21 }
  0x63   : > { %s285_s8 = sshll.u32 %s266_s24, 4  ;;  %s3701_s16 = smov 2048   ;;  %s286_s8 = int_to_ptr.vmem [resolvable:$true] %s285_s8 }
  0x64   : > { %s3162_s19 = scalar_select %p4226_p4, [#allocation0], [#allocation14] }
  0x65   : > { %3163 = sst [smem:[#allocation13]] (%p4226_p4), %s3701_s16  ;;  %s3702_s14 = smov 1024  }
  0x66   : > { %s277_s13 = sld [smem:[%s3162_s19]]   ;;  %s3703_s27 = smov 16  }
  0x67   : > { %3164 = sst [smem:[#allocation13 + $0x1]] (%p4226_p4), %s3702_s14  ;;  %s3704_s17 = smov 64  }
  0x68   : > { %3165 = sst [smem:[#allocation13 + $0x2]] (%p4226_p4), %s3703_s27  ;;  %s3705_s20 = smov 4  }
  0x69   : > { %3166 = sst [smem:[#allocation13 + $0x3]] (%p4226_p4), %s3704_s17  ;;  %s263_s9 = scalar_lea.sflag [#allocation4], %s262_s30 }
  0x6a   : > { %3167 = sst [smem:[#allocation13 + $0x4]] (%p4226_p4), %s3704_s17  ;;  %s3706_s21 = smov [#allocation12]  }
  0x6b   : > { %3168 = sst [smem:[#allocation13 + $0x5]] (%p4226_p4), %s3705_s20 }
  0x6c   : > { %s2877_s18 = sshll.u32 %s277_s13, 26 }
  0x6d   : > { %s2878_s29 = sadd.s32 134217728, %s2877_s18 }
  0x6e   : > { %3169 = dma.general (%p4226_p4), %s272_s23, 2048, %s286_s8, %s263_s9, %s3706_s21, [#allocation13], %s2878_s29, 0  }
  0x6f PF: > { %p4227_p10 = scmp.ne.s32.totalorder %s4223_s12, 0 }
  0x70   : > { %s312_s22 = sand.u32 (!%p4227_p10), 1, %s3684_s25   ;;  %p4228_p12 = scmp.ne.s32.totalorder (!%p4227_p10), %s4222_s11, 0 }
  0x71   : > { %310 = sbr.rel (%p4227_p10) target bundleno = 1118 (0x45e), region = 48  ;;  %s2880_s15 = sshll.u32 (!%p4227_p10), %s312_s22, 7 }
  0x72   : > { %s313_s19 = scalar_lea.sflag (!%p4227_p10), [#allocation4], %s312_s22  ;;  %s3913_s24 = scalar_lea.vmem (!%p4227_p10), [#allocation3], %s2880_s15 }
  0x78   : > { %3663 = dma.done.wait (%p4228_p12), %s313_s19, 2048  }
  0x79   : > { %3665 = vsyncadd (%p4228_p12), %s313_s19, 4294965248  ;;  %p4229_p0 = scmp.eq.s32.totalorder %s3770_s28, 0 }
  0x7b   : > { %3667 = dma.done.wait (%p4229_p0), [#allocation7], 20480   ;;  %p4230_p2 = pmov %p4229_p0 }
  0x7c   : > { %p4231_p3 = pmov %p4229_p0 }
  0x7d   : > { %3669 = vsyncadd (%p4230_p2), [#allocation7], 4294946816 }
  0x7e   : > { %3671 = dma.done.wait (%p4231_p3), [#allocation10], 4096   ;;  %p4232_p6 = pmov %p4229_p0 }
  0x7f   : > { %p4233_p7 = scmp.ne.s32.totalorder %s3770_s28, 0 }
  0x80   : > { %3673 = vsyncadd (%p4232_p6), [#allocation10], 4294963200  ;;  %v3707_v0 = vmov (!%p4233_p7), 0.0  }
  0x81   : > { %359 = sbr.rel (%p4233_p7) target bundleno = 136 (0x88), region = 68  ;;  %360 = vst [vmem:[#allocation2] sm:$0xff] (!%p4233_p7), %v3707_v0 }
  0x88 PF: > { %v3248_v1 = vld [vmem:[#allocation6 + $0x4] ss:$16 sps:$4 sm:$0xff]   ;;  %v3250_v2 = vld [vmem:[#allocation6 + $0xc] ss:$16 sps:$4 sm:$0xff]   ;;  %v3708_v3 = vmov 0   ;;  %v427_v50 = vlaneseq  ;;  %vm1433_vm0 = vcmask 1041409  }
  0x89   : > { %735 = vmatprep.mubr.bf16.mxu0 %v3708_v3  ;;  %928 = vmatprep.mubr.bf16.mxu1 %v3708_v3  ;;  %v3252_v4 = vld [vmem:[#allocation6] ss:$16 sps:$4 sm:$0xff]   ;;  %v3253_v5 = vld [vmem:[#allocation6 + $0x8] ss:$16 sps:$4 sm:$0xff]   ;;  %v3254_v6 = vld [vmem:[#allocation6 + $0x24] ss:$16 sps:$4 sm:$0xff]  }
  0x8a   : > { %703 = vmatprep.subr.bf16.mxu0 %v3248_v1  ;;  %896 = vmatprep.subr.bf16.mxu1 %v3250_v2  ;;  %v3256_v7 = vld [vmem:[#allocation6 + $0x2c] ss:$16 sps:$4 sm:$0xff]   ;;  %v3258_v8 = vld [vmem:[#allocation6 + $0x20] ss:$16 sps:$4 sm:$0xff]   ;;  %v3259_v9 = vld [vmem:[#allocation6 + $0x28] ss:$16 sps:$4 sm:$0xff]  }
  0x8b   : > { %704 = vmatpush1.bf16.msra.mxu0 %v3252_v4  ;;  %897 = vmatpush1.bf16.msra.mxu1 %v3253_v5  ;;  %v3260_v10 = vld [vmem:[#allocation6 + $0x44] ss:$16 sps:$4 sm:$0xff]   ;;  %v3262_v11 = vld [vmem:[#allocation6 + $0x4c] ss:$16 sps:$4 sm:$0xff]   ;;  %v3264_v12 = vld [vmem:[#allocation6 + $0x40] ss:$16 sps:$4 sm:$0xff]  }
  0x8c   : > { %705 = vmatprep.subr.bf16.mxu0 %v3254_v6  ;;  %898 = vmatprep.subr.bf16.mxu1 %v3256_v7  ;;  %v3265_v13 = vld [vmem:[#allocation6 + $0x48] ss:$16 sps:$4 sm:$0xff]   ;;  %v3266_v14 = vld [vmem:[#allocation6 + $0x64] ss:$16 sps:$4 sm:$0xff]   ;;  %v3268_v15 = vld [vmem:[#allocation6 + $0x6c] ss:$16 sps:$4 sm:$0xff]  }
  0x8d   : > { %v3270_v16 = vld [vmem:[#allocation6 + $0x60] ss:$16 sps:$4 sm:$0xff]   ;;  %v3271_v17 = vld [vmem:[#allocation6 + $0x68] ss:$16 sps:$4 sm:$0xff]   ;;  %v3272_v18 = vld [vmem:[#allocation6 + $0x84] ss:$16 sps:$4 sm:$0xff]  }
  0x8e   : > { %v3274_v19 = vld [vmem:[#allocation6 + $0x8c] ss:$16 sps:$4 sm:$0xff]   ;;  %v3276_v20 = vld [vmem:[#allocation6 + $0x80] ss:$16 sps:$4 sm:$0xff]   ;;  %v3277_v21 = vld [vmem:[#allocation6 + $0x88] ss:$16 sps:$4 sm:$0xff]  }
  0x8f   : > { %706 = vmatpush1.bf16.msra.mxu0 %v3258_v8  ;;  %899 = vmatpush1.bf16.msra.mxu1 %v3259_v9  ;;  %v3278_v22 = vld [vmem:[#allocation6 + $0xa4] ss:$16 sps:$4 sm:$0xff]   ;;  %v3280_v23 = vld [vmem:[#allocation6 + $0xac] ss:$16 sps:$4 sm:$0xff]   ;;  %v3282_v24 = vld [vmem:[#allocation6 + $0xa0] ss:$16 sps:$4 sm:$0xff]  }
  0x90   : > { %707 = vmatprep.subr.bf16.mxu0 %v3260_v10  ;;  %900 = vmatprep.subr.bf16.mxu1 %v3262_v11  ;;  %v3283_v25 = vld [vmem:[#allocation6 + $0xa8] ss:$16 sps:$4 sm:$0xff]   ;;  %v3284_v26 = vld [vmem:[#allocation6 + $0xc4] ss:$16 sps:$4 sm:$0xff]   ;;  %v3286_v27 = vld [vmem:[#allocation6 + $0xcc] ss:$16 sps:$4 sm:$0xff]  }
  0x91   : > { %v3288_v28 = vld [vmem:[#allocation6 + $0xc0] ss:$16 sps:$4 sm:$0xff]   ;;  %v3289_v29 = vld [vmem:[#allocation6 + $0xc8] ss:$16 sps:$4 sm:$0xff]   ;;  %v3290_v30 = vld [vmem:[#allocation6 + $0xe4] ss:$16 sps:$4 sm:$0xff]  }
  0x92   : > { %v3292_v31 = vld [vmem:[#allocation6 + $0xec] ss:$16 sps:$4 sm:$0xff]   ;;  %v3294_v32 = vld [vmem:[#allocation6 + $0xe0] ss:$16 sps:$4 sm:$0xff]   ;;  %v3295_v33 = vld [vmem:[#allocation6 + $0xe8] ss:$16 sps:$4 sm:$0xff]  }
  0x93   : > { %708 = vmatpush1.bf16.msra.mxu0 %v3264_v12  ;;  %901 = vmatpush1.bf16.msra.mxu1 %v3265_v13  ;;  %v3296_v34 = vld [vmem:[%s3913_s24] sm:$0xff]   ;;  %v3297_v35 = vld [vmem:[%s3913_s24 + $0x8] sm:$0xff]   ;;  %v3298_v36 = vld [vmem:[%s3913_s24 + $0x10] sm:$0xff]   ;;  %v3977_v51 = vshrl.u32 %v427_v50, 7  ;;  %vm1435_vm1 = vcmask 1043459   ;;  %vm1437_vm2 = vcmask 1045509  }
  0x94   : > { %709 = vmatprep.subr.bf16.mxu0 %v3266_v14  ;;  %902 = vmatprep.subr.bf16.mxu1 %v3268_v15  ;;  %v3299_v37 = vld [vmem:[%s3913_s24 + $0x18] sm:$0xff]   ;;  %v3300_v38 = vld [vmem:[%s3913_s24 + $0x20] sm:$0xff]   ;;  %v3301_v39 = vld [vmem:[%s3913_s24 + $0x28] sm:$0xff]   ;;  %vm1439_vm3 = vcmask 1047559   ;;  %p2933_p11 = scmp.ne.s32.totalorder %s3770_s28, 1 }
  0x95   : > { %v3302_v40 = vld [vmem:[%s3913_s24 + $0x30] sm:$0xff]   ;;  %v3303_v41 = vld [vmem:[%s3913_s24 + $0x38] sm:$0xff]   ;;  %v3304_v42 = vld [vmem:[%s3913_s24 + $0x40] sm:$0xff]   ;;  %v429_v52 = vsub.s32 0, %v3977_v51  ;;  %v437_v53 = vsub.s32 2, %v3977_v51  ;;  %v433_v55 = vsub.s32 1, %v3977_v51 }
  0x96   : > { %v3305_v43 = vld [vmem:[%s3913_s24 + $0x48] sm:$0xff]   ;;  %v3306_v44 = vld [vmem:[%s3913_s24 + $0x50] sm:$0xff]   ;;  %v3307_v45 = vld [vmem:[%s3913_s24 + $0x58] sm:$0xff]   ;;  %v441_v56 = vsub.s32 3, %v3977_v51 }
  0x97   : > { %710 = vmatpush1.bf16.msra.mxu0 %v3270_v16  ;;  %903 = vmatpush1.bf16.msra.mxu1 %v3271_v17  ;;  %v3308_v46 = vld [vmem:[%s3913_s24 + $0x60] sm:$0xff]   ;;  %v3309_v47 = vld [vmem:[%s3913_s24 + $0x68] sm:$0xff]   ;;  %v3310_v48 = vld [vmem:[%s3913_s24 + $0x70] sm:$0xff]  }
  0x98   : > { %711 = vmatprep.subr.bf16.mxu0 %v3272_v18  ;;  %904 = vmatprep.subr.bf16.mxu1 %v3274_v19  ;;  %v3311_v49 = vld [vmem:[%s3913_s24 + $0x78] sm:$0xff]  }
  0x99   : > { %v425_v54 = vld [vmem:[%s4207_s2] sm:$0xf] }
  0x9a   : > { %v3988_v57 = vrot.slane %v425_v54, %v429_v52  ;;  %v3992_v58 = vrot.slane %v425_v54, %v437_v53  ;;  %v3996_v59 = vrot.slane %v425_v54, %v433_v55  ;;  %v4000_v60 = vrot.slane %v425_v54, %v441_v56 }
  0x9b   : > { %712 = vmatpush1.bf16.msra.mxu0 %v3276_v20  ;;  %905 = vmatpush1.bf16.msra.mxu1 %v3277_v21 }
  0x9c   : > { %713 = vmatprep.subr.bf16.mxu0 %v3278_v22  ;;  %906 = vmatprep.subr.bf16.mxu1 %v3280_v23 }
  0x9f   : > { %714 = vmatpush1.bf16.msra.mxu0 %v3282_v24  ;;  %907 = vmatpush1.bf16.msra.mxu1 %v3283_v25 }
  0xa0   : > { %715 = vmatprep.subr.bf16.mxu0 %v3284_v26  ;;  %908 = vmatprep.subr.bf16.mxu1 %v3286_v27 }
  0xa3   : > { %716 = vmatpush1.bf16.msra.mxu0 %v3288_v28  ;;  %909 = vmatpush1.bf16.msra.mxu1 %v3289_v29 }
  0xa4   : > { %717 = vmatprep.subr.bf16.mxu0 %v3290_v30  ;;  %910 = vmatprep.subr.bf16.mxu1 %v3292_v31 }
  0xa7   : > { %718 = vmatpush1.bf16.msra.mxu0 %v3294_v32  ;;  %911 = vmatpush1.bf16.msra.mxu1 %v3295_v33 }
  0xaa   : > { %736 = vmatmul.mubr.bf16.vlgmr.msra.gmra.mrb[0].mxu0 %v3296_v34  ;;  %929 = vmatmul.mubr.bf16.vlgmr.msra.gmra.mrb[0].mxu1 %v3296_v34 }
  0xab   : > { %745 = vmatprep.mubr.bf16.mxu0 %v3708_v3  ;;  %938 = vmatprep.mubr.bf16.mxu1 %v3708_v3 }
  0xb2   : > { %746 = vmatmul.mubr.bf16.gmra.mrb[4].mxu0 %v3297_v35  ;;  %939 = vmatmul.mubr.bf16.gmra.mrb[4].mxu1 %v3297_v35 }
  0xb3   : > { %755 = vmatprep.mubr.bf16.mxu0 %v3708_v3  ;;  %948 = vmatprep.mubr.bf16.mxu1 %v3708_v3 }
  0xba   : > { %756 = vmatmul.mubr.bf16.gmra.mrb[8].mxu0 %v3298_v36  ;;  %949 = vmatmul.mubr.bf16.gmra.mrb[8].mxu1 %v3298_v36 }
  0xbb   : > { %765 = vmatprep.mubr.bf16.mxu0 %v3708_v3  ;;  %958 = vmatprep.mubr.bf16.mxu1 %v3708_v3 }
  0xc2   : > { %766 = vmatmul.mubr.bf16.gmra.mrb[12].mxu0 %v3299_v37  ;;  %959 = vmatmul.mubr.bf16.gmra.mrb[12].mxu1 %v3299_v37 }
  0xc3   : > { %775 = vmatprep.mubr.bf16.mxu0 %v3708_v3  ;;  %968 = vmatprep.mubr.bf16.mxu1 %v3708_v3 }
  0xca   : > { %776 = vmatmul.mubr.bf16.gmra.mrb[16].mxu0 %v3300_v38  ;;  %969 = vmatmul.mubr.bf16.gmra.mrb[16].mxu1 %v3300_v38 }
  0xcb   : > { %785 = vmatprep.mubr.bf16.mxu0 %v3708_v3  ;;  %978 = vmatprep.mubr.bf16.mxu1 %v3708_v3 }
  0xd2   : > { %786 = vmatmul.mubr.bf16.gmra.mrb[20].mxu0 %v3301_v39  ;;  %979 = vmatmul.mubr.bf16.gmra.mrb[20].mxu1 %v3301_v39 }
  0xd3   : > { %795 = vmatprep.mubr.bf16.mxu0 %v3708_v3  ;;  %988 = vmatprep.mubr.bf16.mxu1 %v3708_v3 }
  0xda   : > { %796 = vmatmul.mubr.bf16.gmra.mrb[24].mxu0 %v3302_v40  ;;  %989 = vmatmul.mubr.bf16.gmra.mrb[24].mxu1 %v3302_v40 }
  0xdb   : > { %805 = vmatprep.mubr.bf16.mxu0 %v3708_v3  ;;  %998 = vmatprep.mubr.bf16.mxu1 %v3708_v3 }
  0xe2   : > { %806 = vmatmul.mubr.bf16.gmra.mrb[28].mxu0 %v3303_v41  ;;  %999 = vmatmul.mubr.bf16.gmra.mrb[28].mxu1 %v3303_v41 }
  0xe3   : > { %815 = vmatprep.mubr.bf16.mxu0 %v3708_v3  ;;  %1008 = vmatprep.mubr.bf16.mxu1 %v3708_v3 }
  0xea   : > { %816 = vmatmul.mubr.bf16.gmra.mrb[32].mxu0 %v3304_v42  ;;  %1009 = vmatmul.mubr.bf16.gmra.mrb[32].mxu1 %v3304_v42 }
  0xeb   : > { %825 = vmatprep.mubr.bf16.mxu0 %v3708_v3  ;;  %1018 = vmatprep.mubr.bf16.mxu1 %v3708_v3 }
  0xf2   : > { %826 = vmatmul.mubr.bf16.gmra.mrb[36].mxu0 %v3305_v43  ;;  %1019 = vmatmul.mubr.bf16.gmra.mrb[36].mxu1 %v3305_v43 }
  0xf3   : > { %835 = vmatprep.mubr.bf16.mxu0 %v3708_v3  ;;  %1028 = vmatprep.mubr.bf16.mxu1 %v3708_v3 }
  0xfa   : > { %836 = vmatmul.mubr.bf16.gmra.mrb[40].mxu0 %v3306_v44  ;;  %1029 = vmatmul.mubr.bf16.gmra.mrb[40].mxu1 %v3306_v44 }
  0xfb   : > { %845 = vmatprep.mubr.bf16.mxu0 %v3708_v3  ;;  %1038 = vmatprep.mubr.bf16.mxu1 %v3708_v3 }
 0x102   : > { %846 = vmatmul.mubr.bf16.gmra.mrb[44].mxu0 %v3307_v45  ;;  %1039 = vmatmul.mubr.bf16.gmra.mrb[44].mxu1 %v3307_v45 }
 0x103   : > { %855 = vmatprep.mubr.bf16.mxu0 %v3708_v3  ;;  %1048 = vmatprep.mubr.bf16.mxu1 %v3708_v3 }
 0x10a   : > { %856 = vmatmul.mubr.bf16.gmra.mrb[48].mxu0 %v3308_v46  ;;  %1049 = vmatmul.mubr.bf16.gmra.mrb[48].mxu1 %v3308_v46 }
 0x10b   : > { %865 = vmatprep.mubr.bf16.mxu0 %v3708_v3  ;;  %1058 = vmatprep.mubr.bf16.mxu1 %v3708_v3 }
 0x112   : > { %866 = vmatmul.mubr.bf16.gmra.mrb[52].mxu0 %v3309_v47  ;;  %1059 = vmatmul.mubr.bf16.gmra.mrb[52].mxu1 %v3309_v47 }
 0x113   : > { %875 = vmatprep.mubr.bf16.mxu0 %v3708_v3  ;;  %1068 = vmatprep.mubr.bf16.mxu1 %v3708_v3 }
 0x11a   : > { %876 = vmatmul.mubr.bf16.gmra.mrb[56].mxu0 %v3310_v48  ;;  %1069 = vmatmul.mubr.bf16.gmra.mrb[56].mxu1 %v3310_v48 }
 0x11b   : > { %885 = vmatprep.mubr.bf16.mxu0 %v3708_v3  ;;  %1078 = vmatprep.mubr.bf16.mxu1 %v3708_v3 }
 0x122   : > { %886 = vmatmul.mubr.bf16.gmra.mrb[60].mxu0 %v3311_v49  ;;  %1079 = vmatmul.mubr.bf16.gmra.mrb[60].mxu1 %v3311_v49 }
 0x17d   : > { %v737_v61 = vpop.f32.mrb[0].mxu0  ;;  %v930_v62 = vpop.f32.mrb[0].mxu1 }
 0x17e   : > { %v738_v63 = vadd.f32 %v737_v61, %v3988_v57  ;;  %v931_v0 = vadd.f32 %v930_v62, %v3992_v58  ;;  %v739_v1 = vpop.f32.mrb[1].mxu0  ;;  %v932_v2 = vpop.f32.mrb[1].mxu1 }
 0x17f   : > { %v740_v3 = vadd.f32 %v739_v1, %v3996_v59  ;;  %v933_v4 = vadd.f32 %v932_v2, %v4000_v60  ;;  %v741_v5 = vpop.f32.mrb[2].mxu0  ;;  %v934_v6 = vpop.f32.mrb[2].mxu1 }
 0x180   : > { %v742_v7 = vadd.f32 %v741_v5, %v3988_v57  ;;  %v935_v8 = vadd.f32 %v934_v6, %v3992_v58  ;;  %v743_v9 = vpop.f32.mrb[3].mxu0  ;;  %v936_v10 = vpop.f32.mrb[3].mxu1  ;;  %v1089_v13 = vmax.f32 %v738_v63, 0.0  ;;  %v1091_v14 = vmax.f32 %v931_v0, 0.0 }
 0x181   : > { %v744_v11 = vadd.f32 %v743_v9, %v3996_v59  ;;  %v937_v12 = vadd.f32 %v936_v10, %v4000_v60  ;;  %v1090_v17 = vmax.f32 %v740_v3, 0.0  ;;  %v1092_v18 = vmax.f32 %v933_v4, 0.0 }
 0x182   : > { %v1093_v15 = vmax.f32 %v742_v7, 0.0  ;;  %v1095_v16 = vmax.f32 %v935_v8, 0.0 }
 0x183   : > { %v1094_v19 = vmax.f32 %v744_v11, 0.0  ;;  %v1096_v20 = vmax.f32 %v937_v12, 0.0 }
 0x184   : > { %v1218_v21 = vadd.f32 %v1093_v15, %v1089_v13  ;;  %v1260_v22 = vadd.f32 %v1095_v16, %v1091_v14 }
 0x185   : > { %v1239_v23 = vadd.f32 %v1094_v19, %v1090_v17  ;;  %v1281_v24 = vadd.f32 %v1096_v20, %v1092_v18  ;;  %v747_v25 = vpop.f32.mrb[4].mxu0  ;;  %v940_v26 = vpop.f32.mrb[4].mxu1 }
 0x186   : > { %v748_v27 = vadd.f32 %v747_v25, %v3988_v57  ;;  %v941_v28 = vadd.f32 %v940_v26, %v3992_v58  ;;  %v749_v29 = vpop.f32.mrb[5].mxu0  ;;  %v942_v30 = vpop.f32.mrb[5].mxu1 }
 0x187   : > { %v750_v31 = vadd.f32 %v749_v29, %v3996_v59  ;;  %v943_v32 = vadd.f32 %v942_v30, %v4000_v60  ;;  %v751_v33 = vpop.f32.mrb[6].mxu0  ;;  %v944_v34 = vpop.f32.mrb[6].mxu1 }
 0x188   : > { %v1097_v35 = vmax.f32 %v748_v27, 0.0  ;;  %v1099_v36 = vmax.f32 %v941_v28, 0.0  ;;  %v752_v37 = vadd.f32 %v751_v33, %v3988_v57  ;;  %v945_v38 = vadd.f32 %v944_v34, %v3992_v58  ;;  %v753_v39 = vpop.f32.mrb[7].mxu0  ;;  %v946_v40 = vpop.f32.mrb[7].mxu1 }
 0x189   : > { %v1098_v41 = vmax.f32 %v750_v31, 0.0  ;;  %v1100_v42 = vmax.f32 %v943_v32, 0.0  ;;  %v754_v43 = vadd.f32 %v753_v39, %v3996_v59  ;;  %v947_v44 = vadd.f32 %v946_v40, %v4000_v60 }
 0x18a   : > { %v1219_v45 = vadd.f32 %v1218_v21, %v1097_v35  ;;  %v1261_v46 = vadd.f32 %v1260_v22, %v1099_v36  ;;  %v1101_v47 = vmax.f32 %v752_v37, 0.0  ;;  %v1103_v48 = vmax.f32 %v945_v38, 0.0 }
 0x18b   : > { %v1240_v49 = vadd.f32 %v1239_v23, %v1098_v41  ;;  %v1282_v50 = vadd.f32 %v1281_v24, %v1100_v42  ;;  %v1102_v54 = vmax.f32 %v754_v43, 0.0  ;;  %v1104_v61 = vmax.f32 %v947_v44, 0.0 }
 0x18c   : > { %v1220_v62 = vadd.f32 %v1219_v45, %v1101_v47  ;;  %v1262_v63 = vadd.f32 %v1261_v46, %v1103_v48 }
 0x18d   : > { %v1241_v0 = vadd.f32 %v1240_v49, %v1102_v54  ;;  %v1283_v1 = vadd.f32 %v1282_v50, %v1104_v61  ;;  %v757_v2 = vpop.f32.mrb[8].mxu0  ;;  %v950_v3 = vpop.f32.mrb[8].mxu1 }
 0x18e   : > { %v758_v4 = vadd.f32 %v757_v2, %v3988_v57  ;;  %v951_v5 = vadd.f32 %v950_v3, %v3992_v58  ;;  %v759_v6 = vpop.f32.mrb[9].mxu0  ;;  %v952_v7 = vpop.f32.mrb[9].mxu1 }
 0x18f   : > { %v760_v8 = vadd.f32 %v759_v6, %v3996_v59  ;;  %v953_v9 = vadd.f32 %v952_v7, %v4000_v60  ;;  %v761_v10 = vpop.f32.mrb[10].mxu0  ;;  %v954_v11 = vpop.f32.mrb[10].mxu1 }
 0x190   : > { %v1105_v12 = vmax.f32 %v758_v4, 0.0  ;;  %v1107_v13 = vmax.f32 %v951_v5, 0.0  ;;  %v762_v14 = vadd.f32 %v761_v10, %v3988_v57  ;;  %v955_v15 = vadd.f32 %v954_v11, %v3992_v58  ;;  %v763_v16 = vpop.f32.mrb[11].mxu0  ;;  %v956_v17 = vpop.f32.mrb[11].mxu1 }
 0x191   : > { %v1106_v18 = vmax.f32 %v760_v8, 0.0  ;;  %v1108_v19 = vmax.f32 %v953_v9, 0.0  ;;  %v764_v20 = vadd.f32 %v763_v16, %v3996_v59  ;;  %v957_v21 = vadd.f32 %v956_v17, %v4000_v60 }
 0x192   : > { %v1221_v22 = vadd.f32 %v1220_v62, %v1105_v12  ;;  %v1263_v23 = vadd.f32 %v1262_v63, %v1107_v13  ;;  %v1109_v24 = vmax.f32 %v762_v14, 0.0  ;;  %v1111_v25 = vmax.f32 %v955_v15, 0.0 }
 0x193   : > { %v1242_v26 = vadd.f32 %v1241_v0, %v1106_v18  ;;  %v1284_v27 = vadd.f32 %v1283_v1, %v1108_v19  ;;  %v1110_v28 = vmax.f32 %v764_v20, 0.0  ;;  %v1112_v29 = vmax.f32 %v957_v21, 0.0 }
 0x194   : > { %v1222_v30 = vadd.f32 %v1221_v22, %v1109_v24  ;;  %v1264_v31 = vadd.f32 %v1263_v23, %v1111_v25 }
 0x195   : > { %v1243_v32 = vadd.f32 %v1242_v26, %v1110_v28  ;;  %v1285_v33 = vadd.f32 %v1284_v27, %v1112_v29  ;;  %v767_v34 = vpop.f32.mrb[12].mxu0  ;;  %v960_v35 = vpop.f32.mrb[12].mxu1 }
 0x196   : > { %v768_v36 = vadd.f32 %v767_v34, %v3988_v57  ;;  %v961_v37 = vadd.f32 %v960_v35, %v3992_v58  ;;  %v769_v38 = vpop.f32.mrb[13].mxu0  ;;  %v962_v39 = vpop.f32.mrb[13].mxu1 }
 0x197   : > { %v770_v40 = vadd.f32 %v769_v38, %v3996_v59  ;;  %v963_v41 = vadd.f32 %v962_v39, %v4000_v60  ;;  %v771_v42 = vpop.f32.mrb[14].mxu0  ;;  %v964_v43 = vpop.f32.mrb[14].mxu1 }
 0x198   : > { %v1113_v44 = vmax.f32 %v768_v36, 0.0  ;;  %v1115_v45 = vmax.f32 %v961_v37, 0.0  ;;  %v772_v46 = vadd.f32 %v771_v42, %v3988_v57  ;;  %v965_v47 = vadd.f32 %v964_v43, %v3992_v58  ;;  %v773_v48 = vpop.f32.mrb[15].mxu0  ;;  %v966_v49 = vpop.f32.mrb[15].mxu1 }
 0x199   : > { %v1114_v50 = vmax.f32 %v770_v40, 0.0  ;;  %v1116_v54 = vmax.f32 %v963_v41, 0.0  ;;  %v774_v61 = vadd.f32 %v773_v48, %v3996_v59  ;;  %v967_v62 = vadd.f32 %v966_v49, %v4000_v60 }
 0x19a   : > { %v1223_v63 = vadd.f32 %v1222_v30, %v1113_v44  ;;  %v1265_v0 = vadd.f32 %v1264_v31, %v1115_v45  ;;  %v1117_v1 = vmax.f32 %v772_v46, 0.0  ;;  %v1119_v2 = vmax.f32 %v965_v47, 0.0 }
 0x19b   : > { %v1244_v3 = vadd.f32 %v1243_v32, %v1114_v50  ;;  %v1286_v4 = vadd.f32 %v1285_v33, %v1116_v54  ;;  %v1118_v5 = vmax.f32 %v774_v61, 0.0  ;;  %v1120_v6 = vmax.f32 %v967_v62, 0.0 }
 0x19c   : > { %v1224_v7 = vadd.f32 %v1223_v63, %v1117_v1  ;;  %v1266_v8 = vadd.f32 %v1265_v0, %v1119_v2 }
 0x19d   : > { %v1245_v9 = vadd.f32 %v1244_v3, %v1118_v5  ;;  %v1287_v10 = vadd.f32 %v1286_v4, %v1120_v6  ;;  %v777_v11 = vpop.f32.mrb[16].mxu0  ;;  %v970_v12 = vpop.f32.mrb[16].mxu1 }
 0x19e   : > { %v778_v13 = vadd.f32 %v777_v11, %v3988_v57  ;;  %v971_v14 = vadd.f32 %v970_v12, %v3992_v58  ;;  %v779_v15 = vpop.f32.mrb[17].mxu0  ;;  %v972_v16 = vpop.f32.mrb[17].mxu1 }
 0x19f   : > { %v780_v17 = vadd.f32 %v779_v15, %v3996_v59  ;;  %v973_v18 = vadd.f32 %v972_v16, %v4000_v60  ;;  %v781_v19 = vpop.f32.mrb[18].mxu0  ;;  %v974_v20 = vpop.f32.mrb[18].mxu1 }
 0x1a0   : > { %v1121_v21 = vmax.f32 %v778_v13, 0.0  ;;  %v1123_v22 = vmax.f32 %v971_v14, 0.0  ;;  %v782_v23 = vadd.f32 %v781_v19, %v3988_v57  ;;  %v975_v24 = vadd.f32 %v974_v20, %v3992_v58  ;;  %v783_v25 = vpop.f32.mrb[19].mxu0  ;;  %v976_v26 = vpop.f32.mrb[19].mxu1 }
 0x1a1   : > { %v1122_v27 = vmax.f32 %v780_v17, 0.0  ;;  %v1124_v28 = vmax.f32 %v973_v18, 0.0  ;;  %v784_v29 = vadd.f32 %v783_v25, %v3996_v59  ;;  %v977_v30 = vadd.f32 %v976_v26, %v4000_v60 }
 0x1a2   : > { %v1225_v31 = vadd.f32 %v1224_v7, %v1121_v21  ;;  %v1267_v32 = vadd.f32 %v1266_v8, %v1123_v22  ;;  %v1125_v33 = vmax.f32 %v782_v23, 0.0  ;;  %v1127_v34 = vmax.f32 %v975_v24, 0.0 }
 0x1a3   : > { %v1246_v35 = vadd.f32 %v1245_v9, %v1122_v27  ;;  %v1288_v36 = vadd.f32 %v1287_v10, %v1124_v28  ;;  %v1126_v37 = vmax.f32 %v784_v29, 0.0  ;;  %v1128_v38 = vmax.f32 %v977_v30, 0.0 }
 0x1a4   : > { %v1226_v39 = vadd.f32 %v1225_v31, %v1125_v33  ;;  %v1268_v40 = vadd.f32 %v1267_v32, %v1127_v34  ;;  %v3709_v30 = vmov 1983009808  }
 0x1a5   : > { %v1247_v41 = vadd.f32 %v1246_v35, %v1126_v37  ;;  %v1289_v42 = vadd.f32 %v1288_v36, %v1128_v38  ;;  %v787_v43 = vpop.f32.mrb[20].mxu0  ;;  %v980_v44 = vpop.f32.mrb[20].mxu1  ;;  %v1397_v31 = vunpack.c.l.s4 %v3709_v30 }
 0x1a6   : > { %v788_v45 = vadd.f32 %v787_v43, %v3988_v57  ;;  %v981_v46 = vadd.f32 %v980_v44, %v3992_v58  ;;  %v789_v47 = vpop.f32.mrb[21].mxu0  ;;  %v982_v48 = vpop.f32.mrb[21].mxu1 }
 0x1a7   : > { %v790_v49 = vadd.f32 %v789_v47, %v3996_v59  ;;  %v983_v50 = vadd.f32 %v982_v48, %v4000_v60  ;;  %v791_v54 = vpop.f32.mrb[22].mxu0  ;;  %v984_v61 = vpop.f32.mrb[22].mxu1 }
 0x1a8   : > { %v1129_v62 = vmax.f32 %v788_v45, 0.0  ;;  %v1131_v63 = vmax.f32 %v981_v46, 0.0  ;;  %v792_v0 = vadd.f32 %v791_v54, %v3988_v57  ;;  %v985_v1 = vadd.f32 %v984_v61, %v3992_v58  ;;  %v793_v2 = vpop.f32.mrb[23].mxu0  ;;  %v986_v3 = vpop.f32.mrb[23].mxu1 }
 0x1a9   : > { %v1130_v4 = vmax.f32 %v790_v49, 0.0  ;;  %v1132_v5 = vmax.f32 %v983_v50, 0.0  ;;  %v794_v6 = vadd.f32 %v793_v2, %v3996_v59  ;;  %v987_v7 = vadd.f32 %v986_v3, %v4000_v60 }
 0x1aa   : > { %v1227_v8 = vadd.f32 %v1226_v39, %v1129_v62  ;;  %v1269_v9 = vadd.f32 %v1268_v40, %v1131_v63  ;;  %v1133_v10 = vmax.f32 %v792_v0, 0.0  ;;  %v1135_v11 = vmax.f32 %v985_v1, 0.0 }
 0x1ab   : > { %v1248_v12 = vadd.f32 %v1247_v41, %v1130_v4  ;;  %v1290_v13 = vadd.f32 %v1289_v42, %v1132_v5  ;;  %v1134_v14 = vmax.f32 %v794_v6, 0.0  ;;  %v1136_v15 = vmax.f32 %v987_v7, 0.0 }
 0x1ac   : > { %v1228_v16 = vadd.f32 %v1227_v8, %v1133_v10  ;;  %v1270_v17 = vadd.f32 %v1269_v9, %v1135_v11  ;;  %v1398_v9 = vunpack.c.0.s8 %v1397_v31 }
 0x1ad   : > { %v1249_v18 = vadd.f32 %v1248_v12, %v1134_v14  ;;  %v1291_v19 = vadd.f32 %v1290_v13, %v1136_v15  ;;  %v797_v20 = vpop.f32.mrb[24].mxu0  ;;  %v990_v21 = vpop.f32.mrb[24].mxu1 }
 0x1ae   : > { %v798_v22 = vadd.f32 %v797_v20, %v3988_v57  ;;  %v991_v23 = vadd.f32 %v990_v21, %v3992_v58  ;;  %v799_v24 = vpop.f32.mrb[25].mxu0  ;;  %v992_v25 = vpop.f32.mrb[25].mxu1  ;;  %v4067_v31 = vsub.s32 %v1398_v9, %v3977_v51 }
 0x1af   : > { %v800_v26 = vadd.f32 %v799_v24, %v3996_v59  ;;  %v993_v27 = vadd.f32 %v992_v25, %v4000_v60  ;;  %v801_v28 = vpop.f32.mrb[26].mxu0  ;;  %v994_v29 = vpop.f32.mrb[26].mxu1 }
 0x1b0   : > { %v1137_v32 = vmax.f32 %v798_v22, 0.0  ;;  %v1139_v33 = vmax.f32 %v991_v23, 0.0  ;;  %v802_v34 = vadd.f32 %v801_v28, %v3988_v57  ;;  %v995_v35 = vadd.f32 %v994_v29, %v3992_v58  ;;  %v803_v36 = vpop.f32.mrb[27].mxu0  ;;  %v996_v37 = vpop.f32.mrb[27].mxu1 }
 0x1b1   : > { %v1138_v38 = vmax.f32 %v800_v26, 0.0  ;;  %v1140_v39 = vmax.f32 %v993_v27, 0.0  ;;  %v804_v40 = vadd.f32 %v803_v36, %v3996_v59  ;;  %v997_v41 = vadd.f32 %v996_v37, %v4000_v60 }
 0x1b2   : > { %v1229_v42 = vadd.f32 %v1228_v16, %v1137_v32  ;;  %v1271_v43 = vadd.f32 %v1270_v17, %v1139_v33  ;;  %v1141_v44 = vmax.f32 %v802_v34, 0.0  ;;  %v1143_v45 = vmax.f32 %v995_v35, 0.0 }
 0x1b3   : > { %v1250_v46 = vadd.f32 %v1249_v18, %v1138_v38  ;;  %v1292_v47 = vadd.f32 %v1291_v19, %v1140_v39  ;;  %v1142_v48 = vmax.f32 %v804_v40, 0.0  ;;  %v1144_v49 = vmax.f32 %v997_v41, 0.0 }
 0x1b4   : > { %v1230_v50 = vadd.f32 %v1229_v42, %v1141_v44  ;;  %v1272_v54 = vadd.f32 %v1271_v43, %v1143_v45 }
 0x1b5   : > { %v1251_v61 = vadd.f32 %v1250_v46, %v1142_v48  ;;  %v1293_v62 = vadd.f32 %v1292_v47, %v1144_v49  ;;  %v807_v63 = vpop.f32.mrb[28].mxu0  ;;  %v1000_v0 = vpop.f32.mrb[28].mxu1 }
 0x1b6   : > { %v808_v1 = vadd.f32 %v807_v63, %v3988_v57  ;;  %v1001_v2 = vadd.f32 %v1000_v0, %v3992_v58  ;;  %v809_v3 = vpop.f32.mrb[29].mxu0  ;;  %v1002_v4 = vpop.f32.mrb[29].mxu1 }
 0x1b7   : > { %v810_v5 = vadd.f32 %v809_v3, %v3996_v59  ;;  %v1003_v6 = vadd.f32 %v1002_v4, %v4000_v60  ;;  %v811_v7 = vpop.f32.mrb[30].mxu0  ;;  %v1004_v8 = vpop.f32.mrb[30].mxu1 }
 0x1b8   : > { %v1145_v10 = vmax.f32 %v808_v1, 0.0  ;;  %v1147_v11 = vmax.f32 %v1001_v2, 0.0  ;;  %v812_v12 = vadd.f32 %v811_v7, %v3988_v57  ;;  %v1005_v13 = vadd.f32 %v1004_v8, %v3992_v58  ;;  %v813_v14 = vpop.f32.mrb[31].mxu0  ;;  %v1006_v15 = vpop.f32.mrb[31].mxu1 }
 0x1b9   : > { %v1146_v16 = vmax.f32 %v810_v5, 0.0  ;;  %v1148_v17 = vmax.f32 %v1003_v6, 0.0  ;;  %v814_v18 = vadd.f32 %v813_v14, %v3996_v59  ;;  %v1007_v19 = vadd.f32 %v1006_v15, %v4000_v60 }
 0x1ba   : > { %v1231_v20 = vadd.f32 %v1230_v50, %v1145_v10  ;;  %v1273_v21 = vadd.f32 %v1272_v54, %v1147_v11  ;;  %v1149_v22 = vmax.f32 %v812_v12, 0.0  ;;  %v1151_v23 = vmax.f32 %v1005_v13, 0.0 }
 0x1bb   : > { %v1252_v24 = vadd.f32 %v1251_v61, %v1146_v16  ;;  %v1294_v25 = vadd.f32 %v1293_v62, %v1148_v17  ;;  %v1150_v26 = vmax.f32 %v814_v18, 0.0  ;;  %v1152_v27 = vmax.f32 %v1007_v19, 0.0 }
 0x1bc   : > { %v1232_v28 = vadd.f32 %v1231_v20, %v1149_v22  ;;  %v1274_v29 = vadd.f32 %v1273_v21, %v1151_v23 }
 0x1bd   : > { %v1253_v30 = vadd.f32 %v1252_v24, %v1150_v26  ;;  %v1295_v32 = vadd.f32 %v1294_v25, %v1152_v27  ;;  %v817_v33 = vpop.f32.mrb[32].mxu0  ;;  %v1010_v34 = vpop.f32.mrb[32].mxu1 }
 0x1be   : > { %v1233_v35 = vrot.slane %v1232_v28, 4  ;;  %v1275_v36 = vrot.slane %v1274_v29, 4  ;;  %v818_v37 = vadd.f32 %v817_v33, %v3988_v57  ;;  %v1011_v38 = vadd.f32 %v1010_v34, %v3992_v58  ;;  %v819_v39 = vpop.f32.mrb[33].mxu0  ;;  %v1012_v40 = vpop.f32.mrb[33].mxu1 }
 0x1bf   : > { %v1254_v41 = vrot.slane %v1253_v30, 4  ;;  %v1296_v42 = vrot.slane %v1295_v32, 4  ;;  %v820_v43 = vadd.f32 %v819_v39, %v3996_v59  ;;  %v1013_v44 = vadd.f32 %v1012_v40, %v4000_v60  ;;  %v821_v45 = vpop.f32.mrb[34].mxu0  ;;  %v1014_v46 = vpop.f32.mrb[34].mxu1 }
 0x1c0   : > { %v1234_v47 = vadd.f32 %v1233_v35, %v1232_v28  ;;  %v1276_v48 = vadd.f32 %v1275_v36, %v1274_v29  ;;  %v1153_v49 = vmax.f32 %v818_v37, 0.0  ;;  %v1155_v50 = vmax.f32 %v1011_v38, 0.0  ;;  %v823_v54 = vpop.f32.mrb[35].mxu0  ;;  %v1016_v61 = vpop.f32.mrb[35].mxu1 }
 0x1c1   : > { %v1255_v62 = vadd.f32 %v1254_v41, %v1253_v30  ;;  %v1297_v63 = vadd.f32 %v1296_v42, %v1295_v32  ;;  %v1154_v0 = vmax.f32 %v820_v43, 0.0  ;;  %v1156_v1 = vmax.f32 %v1013_v44, 0.0 }
 0x1c2   : > { %v1235_v2 = vrot.slane %v1234_v47, 2  ;;  %v1277_v3 = vrot.slane %v1276_v48, 2  ;;  %v822_v4 = vadd.f32 %v821_v45, %v3988_v57  ;;  %v1015_v5 = vadd.f32 %v1014_v46, %v3992_v58 }
 0x1c3   : > { %v1256_v6 = vrot.slane %v1255_v62, 2  ;;  %v1298_v7 = vrot.slane %v1297_v63, 2  ;;  %v824_v8 = vadd.f32 %v823_v54, %v3996_v59  ;;  %v1017_v9 = vadd.f32 %v1016_v61, %v4000_v60 }
 0x1c4   : > { %v1236_v10 = vadd.f32 %v1235_v2, %v1234_v47  ;;  %v1278_v11 = vadd.f32 %v1277_v3, %v1276_v48  ;;  %v1157_v12 = vmax.f32 %v822_v4, 0.0  ;;  %v1159_v13 = vmax.f32 %v1015_v5, 0.0 }
 0x1c5   : > { %v1257_v14 = vadd.f32 %v1256_v6, %v1255_v62  ;;  %v1299_v15 = vadd.f32 %v1298_v7, %v1297_v63  ;;  %v1158_v16 = vmax.f32 %v824_v8, 0.0  ;;  %v1160_v17 = vmax.f32 %v1017_v9, 0.0  ;;  %v827_v18 = vpop.f32.mrb[36].mxu0  ;;  %v1020_v19 = vpop.f32.mrb[36].mxu1 }
 0x1c6   : > { %v1237_v20 = vrot.slane %v1236_v10, 1  ;;  %v1279_v21 = vrot.slane %v1278_v11, 1  ;;  %v1302_v22 = vadd.f32 %v1157_v12, %v1153_v49  ;;  %v1344_v23 = vadd.f32 %v1159_v13, %v1155_v50  ;;  %v829_v24 = vpop.f32.mrb[37].mxu0  ;;  %v1022_v25 = vpop.f32.mrb[37].mxu1 }
 0x1c7   : > { %v1258_v26 = vrot.slane %v1257_v14, 1  ;;  %v1300_v27 = vrot.slane %v1299_v15, 1  ;;  %v1323_v28 = vadd.f32 %v1158_v16, %v1154_v0  ;;  %v1365_v29 = vadd.f32 %v1160_v17, %v1156_v1  ;;  %v831_v30 = vpop.f32.mrb[38].mxu0  ;;  %v1024_v32 = vpop.f32.mrb[38].mxu1 }
 0x1c8   : > { %v1238_v33 = vadd.f32 %v1237_v20, %v1236_v10  ;;  %v1280_v34 = vadd.f32 %v1279_v21, %v1278_v11  ;;  %v828_v35 = vadd.f32 %v827_v18, %v3988_v57  ;;  %v1021_v36 = vadd.f32 %v1020_v19, %v3992_v58  ;;  %v833_v37 = vpop.f32.mrb[39].mxu0  ;;  %v1026_v38 = vpop.f32.mrb[39].mxu1 }
 0x1c9   : > { %v1259_v39 = vadd.f32 %v1258_v26, %v1257_v14  ;;  %v1301_v40 = vadd.f32 %v1300_v27, %v1299_v15  ;;  %v830_v41 = vadd.f32 %v829_v24, %v3996_v59  ;;  %v1023_v42 = vadd.f32 %v1022_v25, %v4000_v60 }
 0x1ca   : > { %v1161_v43 = vmax.f32 %v828_v35, 0.0  ;;  %v1163_v44 = vmax.f32 %v1021_v36, 0.0  ;;  %v832_v45 = vadd.f32 %v831_v30, %v3988_v57  ;;  %v1025_v46 = vadd.f32 %v1024_v32, %v3992_v58 }
 0x1cb   : > { %v1394_v47 = vcombine.low %v1238_v33, %v1259_v39  ;;  %v1395_v48 = vcombine.low %v1280_v34, %v1301_v40  ;;  %v1162_v49 = vmax.f32 %v830_v41, 0.0  ;;  %v1164_v50 = vmax.f32 %v1023_v42, 0.0 }
 0x1cc   : > { %v1303_v54 = vadd.f32 %v1302_v22, %v1161_v43  ;;  %v1345_v61 = vadd.f32 %v1344_v23, %v1163_v44  ;;  %v1165_v62 = vmax.f32 %v832_v45, 0.0  ;;  %v1167_v63 = vmax.f32 %v1025_v46, 0.0 }
 0x1cd   : > { %v4084_v0 = vrot.slane %v1394_v47, %v4067_v31  ;;  %v4087_v1 = vrot.slane %v1395_v48, %v4067_v31  ;;  %v1324_v2 = vadd.f32 %v1323_v28, %v1162_v49  ;;  %v1366_v3 = vadd.f32 %v1365_v29, %v1164_v50  ;;  %v837_v4 = vpop.f32.mrb[40].mxu0  ;;  %v1030_v5 = vpop.f32.mrb[40].mxu1 }
 0x1ce   : > { %v1304_v6 = vadd.f32 %v1303_v54, %v1165_v62  ;;  %v1346_v7 = vadd.f32 %v1345_v61, %v1167_v63  ;;  %v834_v8 = vadd.f32 %v833_v37, %v3996_v59  ;;  %v1027_v9 = vadd.f32 %v1026_v38, %v4000_v60  ;;  %v839_v10 = vpop.f32.mrb[41].mxu0  ;;  %v1032_v11 = vpop.f32.mrb[41].mxu1 }
 0x1cf   : > { %v1410_v12 = vcombine.low %v4084_v0, %v4087_v1  ;;  %v838_v13 = vadd.f32 %v837_v4, %v3988_v57  ;;  %v1031_v14 = vadd.f32 %v1030_v5, %v3992_v58  ;;  %v840_v15 = vadd.f32 %v839_v10, %v3996_v59  ;;  %v841_v16 = vpop.f32.mrb[42].mxu0  ;;  %v1034_v17 = vpop.f32.mrb[42].mxu1  ;;  %v3320_v0 = vld [vmem:[#allocation8 + $0x2c] ss:$16 sps:$4 sm:$0xff] (!%p2933_p11)   ;;  %v3322_v1 = vld [vmem:[#allocation8 + $0x20] ss:$16 sps:$4 sm:$0xff] (!%p2933_p11)  }
 0x1d0   : > { %v1166_v18 = vmax.f32 %v834_v8, 0.0  ;;  %v1168_v19 = vmax.f32 %v1027_v9, 0.0  ;;  %v1033_v20 = vadd.f32 %v1032_v11, %v4000_v60  ;;  %v842_v21 = vadd.f32 %v841_v16, %v3988_v57  ;;  %v843_v22 = vpop.f32.mrb[43].mxu0  ;;  %v1036_v23 = vpop.f32.mrb[43].mxu1 }
 0x1d1   : > { %v1169_v24 = vmax.f32 %v838_v13, 0.0  ;;  %v1171_v25 = vmax.f32 %v1031_v14, 0.0  ;;  %v1170_v26 = vmax.f32 %v840_v15, 0.0  ;;  %v1035_v27 = vadd.f32 %v1034_v17, %v3992_v58 }
 0x1d2   : > { %v1325_v28 = vadd.f32 %v1324_v2, %v1166_v18  ;;  %v1367_v29 = vadd.f32 %v1366_v3, %v1168_v19  ;;  %v1172_v30 = vmax.f32 %v1033_v20, 0.0  ;;  %v1173_v32 = vmax.f32 %v842_v21, 0.0 }
 0x1d3   : > { %v1305_v33 = vadd.f32 %v1304_v6, %v1169_v24  ;;  %v1347_v34 = vadd.f32 %v1346_v7, %v1171_v25  ;;  %v1175_v35 = vmax.f32 %v1035_v27, 0.0  ;;  %v844_v36 = vadd.f32 %v843_v22, %v3996_v59 }
 0x1d4   : > { %v1326_v37 = vadd.f32 %v1325_v28, %v1170_v26  ;;  %v1368_v38 = vadd.f32 %v1367_v29, %v1172_v30  ;;  %v1037_v39 = vadd.f32 %v1036_v23, %v4000_v60 }
 0x1d5   : > { %v1306_v40 = vadd.f32 %v1305_v33, %v1173_v32  ;;  %v1348_v41 = vadd.f32 %v1347_v34, %v1175_v35  ;;  %v1174_v42 = vmax.f32 %v844_v36, 0.0  ;;  %v847_v43 = vpop.f32.mrb[44].mxu0  ;;  %v1040_v44 = vpop.f32.mrb[44].mxu1 }
 0x1d6   : > { %v1176_v45 = vmax.f32 %v1037_v39, 0.0  ;;  %v848_v46 = vadd.f32 %v847_v43, %v3988_v57  ;;  %v1041_v47 = vadd.f32 %v1040_v44, %v3992_v58  ;;  %v849_v48 = vpop.f32.mrb[45].mxu0  ;;  %v1042_v49 = vpop.f32.mrb[45].mxu1 }
 0x1d7   : > { %v1327_v50 = vadd.f32 %v1326_v37, %v1174_v42  ;;  %v850_v54 = vadd.f32 %v849_v48, %v3996_v59  ;;  %v1043_v61 = vadd.f32 %v1042_v49, %v4000_v60  ;;  %v851_v62 = vpop.f32.mrb[46].mxu0  ;;  %v1044_v63 = vpop.f32.mrb[46].mxu1 }
 0x1d8   : > { %v1369_v2 = vadd.f32 %v1368_v38, %v1176_v45  ;;  %v1177_v3 = vmax.f32 %v848_v46, 0.0  ;;  %v1179_v4 = vmax.f32 %v1041_v47, 0.0  ;;  %v852_v5 = vadd.f32 %v851_v62, %v3988_v57  ;;  %v853_v6 = vpop.f32.mrb[47].mxu0  ;;  %v1046_v7 = vpop.f32.mrb[47].mxu1 }
 0x1d9   : > { %v1178_v8 = vmax.f32 %v850_v54, 0.0  ;;  %v1180_v9 = vmax.f32 %v1043_v61, 0.0  ;;  %v1045_v10 = vadd.f32 %v1044_v63, %v3992_v58  ;;  %v854_v11 = vadd.f32 %v853_v6, %v3996_v59 }
 0x1da   : > { %v1307_v13 = vadd.f32 %v1306_v40, %v1177_v3  ;;  %v1349_v14 = vadd.f32 %v1348_v41, %v1179_v4  ;;  %v1181_v15 = vmax.f32 %v852_v5, 0.0  ;;  %v1047_v16 = vadd.f32 %v1046_v7, %v4000_v60 }
 0x1db   : > { %v1328_v17 = vadd.f32 %v1327_v50, %v1178_v8  ;;  %v1370_v18 = vadd.f32 %v1369_v2, %v1180_v9  ;;  %v1183_v19 = vmax.f32 %v1045_v10, 0.0  ;;  %v1182_v20 = vmax.f32 %v854_v11, 0.0 }
 0x1dc   : > { %v1308_v21 = vadd.f32 %v1307_v13, %v1181_v15  ;;  %v1184_v22 = vmax.f32 %v1047_v16, 0.0 }
 0x1dd   : > { %v1350_v23 = vadd.f32 %v1349_v14, %v1183_v19  ;;  %v1329_v24 = vadd.f32 %v1328_v17, %v1182_v20  ;;  %v857_v25 = vpop.f32.mrb[48].mxu0  ;;  %v1050_v26 = vpop.f32.mrb[48].mxu1 }
 0x1de   : > { %v1371_v27 = vadd.f32 %v1370_v18, %v1184_v22  ;;  %v858_v28 = vadd.f32 %v857_v25, %v3988_v57  ;;  %v1051_v29 = vadd.f32 %v1050_v26, %v3992_v58  ;;  %v859_v30 = vpop.f32.mrb[49].mxu0  ;;  %v1052_v32 = vpop.f32.mrb[49].mxu1 }
 0x1df   : > { %v860_v33 = vadd.f32 %v859_v30, %v3996_v59  ;;  %v1053_v34 = vadd.f32 %v1052_v32, %v4000_v60  ;;  %v861_v35 = vpop.f32.mrb[50].mxu0  ;;  %v1054_v36 = vpop.f32.mrb[50].mxu1 }
 0x1e0   : > { %v1185_v37 = vmax.f32 %v858_v28, 0.0  ;;  %v1187_v38 = vmax.f32 %v1051_v29, 0.0  ;;  %v862_v39 = vadd.f32 %v861_v35, %v3988_v57  ;;  %v1055_v40 = vadd.f32 %v1054_v36, %v3992_v58  ;;  %v863_v41 = vpop.f32.mrb[51].mxu0  ;;  %v1056_v42 = vpop.f32.mrb[51].mxu1 }
 0x1e1   : > { %v1186_v43 = vmax.f32 %v860_v33, 0.0  ;;  %v1188_v44 = vmax.f32 %v1053_v34, 0.0  ;;  %v864_v45 = vadd.f32 %v863_v41, %v3996_v59  ;;  %v1057_v46 = vadd.f32 %v1056_v42, %v4000_v60 }
 0x1e2   : > { %v1309_v47 = vadd.f32 %v1308_v21, %v1185_v37  ;;  %v1351_v48 = vadd.f32 %v1350_v23, %v1187_v38  ;;  %v1189_v49 = vmax.f32 %v862_v39, 0.0  ;;  %v1191_v50 = vmax.f32 %v1055_v40, 0.0 }
 0x1e3   : > { %v1330_v54 = vadd.f32 %v1329_v24, %v1186_v43  ;;  %v1372_v61 = vadd.f32 %v1371_v27, %v1188_v44  ;;  %v1190_v62 = vmax.f32 %v864_v45, 0.0  ;;  %v1192_v63 = vmax.f32 %v1057_v46, 0.0 }
 0x1e4   : > { %v1310_v2 = vadd.f32 %v1309_v47, %v1189_v49  ;;  %v1352_v3 = vadd.f32 %v1351_v48, %v1191_v50 }
 0x1e5   : > { %v1331_v4 = vadd.f32 %v1330_v54, %v1190_v62  ;;  %v1373_v5 = vadd.f32 %v1372_v61, %v1192_v63  ;;  %v867_v6 = vpop.f32.mrb[52].mxu0  ;;  %v1060_v7 = vpop.f32.mrb[52].mxu1 }
 0x1e6   : > { %v868_v8 = vadd.f32 %v867_v6, %v3988_v57  ;;  %v1061_v9 = vadd.f32 %v1060_v7, %v3992_v58  ;;  %v869_v10 = vpop.f32.mrb[53].mxu0  ;;  %v1062_v11 = vpop.f32.mrb[53].mxu1 }
 0x1e7   : > { %v870_v13 = vadd.f32 %v869_v10, %v3996_v59  ;;  %v1063_v14 = vadd.f32 %v1062_v11, %v4000_v60  ;;  %v871_v15 = vpop.f32.mrb[54].mxu0  ;;  %v1064_v16 = vpop.f32.mrb[54].mxu1 }
 0x1e8   : > { %v1193_v17 = vmax.f32 %v868_v8, 0.0  ;;  %v1195_v18 = vmax.f32 %v1061_v9, 0.0  ;;  %v872_v19 = vadd.f32 %v871_v15, %v3988_v57  ;;  %v1065_v20 = vadd.f32 %v1064_v16, %v3992_v58  ;;  %v873_v21 = vpop.f32.mrb[55].mxu0  ;;  %v1066_v22 = vpop.f32.mrb[55].mxu1 }
 0x1e9   : > { %v1194_v23 = vmax.f32 %v870_v13, 0.0  ;;  %v1196_v24 = vmax.f32 %v1063_v14, 0.0  ;;  %v874_v25 = vadd.f32 %v873_v21, %v3996_v59  ;;  %v1067_v26 = vadd.f32 %v1066_v22, %v4000_v60 }
 0x1ea   : > { %v1311_v27 = vadd.f32 %v1310_v2, %v1193_v17  ;;  %v1353_v28 = vadd.f32 %v1352_v3, %v1195_v18  ;;  %v1197_v29 = vmax.f32 %v872_v19, 0.0  ;;  %v1199_v30 = vmax.f32 %v1065_v20, 0.0 }
 0x1eb   : > { %v1332_v32 = vadd.f32 %v1331_v4, %v1194_v23  ;;  %v1374_v33 = vadd.f32 %v1373_v5, %v1196_v24  ;;  %v1198_v34 = vmax.f32 %v874_v25, 0.0  ;;  %v1200_v35 = vmax.f32 %v1067_v26, 0.0 }
 0x1ec   : > { %v1312_v36 = vadd.f32 %v1311_v27, %v1197_v29  ;;  %v1354_v37 = vadd.f32 %v1353_v28, %v1199_v30 }
 0x1ed   : > { %v1333_v38 = vadd.f32 %v1332_v32, %v1198_v34  ;;  %v1375_v39 = vadd.f32 %v1374_v33, %v1200_v35  ;;  %v877_v40 = vpop.f32.mrb[56].mxu0  ;;  %v1070_v41 = vpop.f32.mrb[56].mxu1 }
 0x1ee   : > { %v878_v42 = vadd.f32 %v877_v40, %v3988_v57  ;;  %v1071_v43 = vadd.f32 %v1070_v41, %v3992_v58  ;;  %v879_v44 = vpop.f32.mrb[57].mxu0  ;;  %v1072_v45 = vpop.f32.mrb[57].mxu1 }
 0x1ef   : > { %v880_v46 = vadd.f32 %v879_v44, %v3996_v59  ;;  %v1073_v47 = vadd.f32 %v1072_v45, %v4000_v60  ;;  %v881_v48 = vpop.f32.mrb[58].mxu0  ;;  %v1074_v49 = vpop.f32.mrb[58].mxu1 }
 0x1f0   : > { %v1201_v50 = vmax.f32 %v878_v42, 0.0  ;;  %v1203_v54 = vmax.f32 %v1071_v43, 0.0  ;;  %v882_v61 = vadd.f32 %v881_v48, %v3988_v57  ;;  %v1075_v62 = vadd.f32 %v1074_v49, %v3992_v58  ;;  %v883_v63 = vpop.f32.mrb[59].mxu0  ;;  %v1076_v2 = vpop.f32.mrb[59].mxu1 }
 0x1f1   : > { %v1202_v3 = vmax.f32 %v880_v46, 0.0  ;;  %v1204_v4 = vmax.f32 %v1073_v47, 0.0  ;;  %v884_v5 = vadd.f32 %v883_v63, %v3996_v59  ;;  %v1077_v6 = vadd.f32 %v1076_v2, %v4000_v60 }
 0x1f2   : > { %v1313_v7 = vadd.f32 %v1312_v36, %v1201_v50  ;;  %v1355_v8 = vadd.f32 %v1354_v37, %v1203_v54  ;;  %v1205_v9 = vmax.f32 %v882_v61, 0.0  ;;  %v1207_v10 = vmax.f32 %v1075_v62, 0.0 }
 0x1f3   : > { %v1334_v11 = vadd.f32 %v1333_v38, %v1202_v3  ;;  %v1376_v13 = vadd.f32 %v1375_v39, %v1204_v4  ;;  %v1206_v14 = vmax.f32 %v884_v5, 0.0  ;;  %v1208_v15 = vmax.f32 %v1077_v6, 0.0 }
 0x1f4   : > { %v1314_v16 = vadd.f32 %v1313_v7, %v1205_v9  ;;  %v1356_v17 = vadd.f32 %v1355_v8, %v1207_v10 }
 0x1f5   : > { %v1335_v18 = vadd.f32 %v1334_v11, %v1206_v14  ;;  %v1377_v19 = vadd.f32 %v1376_v13, %v1208_v15  ;;  %v887_v20 = vpop.f32.mrb[60].mxu0  ;;  %v1080_v21 = vpop.f32.mrb[60].mxu1 }
 0x1f6   : > { %v888_v22 = vadd.f32 %v887_v20, %v3988_v57  ;;  %v1081_v23 = vadd.f32 %v1080_v21, %v3992_v58  ;;  %v889_v24 = vpop.f32.mrb[61].mxu0  ;;  %v1082_v25 = vpop.f32.mrb[61].mxu1 }
 0x1f7   : > { %v890_v26 = vadd.f32 %v889_v24, %v3996_v59  ;;  %v1083_v27 = vadd.f32 %v1082_v25, %v4000_v60  ;;  %v891_v28 = vpop.f32.mrb[62].mxu0  ;;  %v1084_v29 = vpop.f32.mrb[62].mxu1 }
 0x1f8   : > { %v1209_v30 = vmax.f32 %v888_v22, 0.0  ;;  %v1211_v32 = vmax.f32 %v1081_v23, 0.0  ;;  %v892_v33 = vadd.f32 %v891_v28, %v3988_v57  ;;  %v1085_v34 = vadd.f32 %v1084_v29, %v3992_v58  ;;  %v893_v35 = vpop.f32.mrb[63].mxu0  ;;  %v1086_v36 = vpop.f32.mrb[63].mxu1  ;;  %v1217_v28 = vld [vmem:[#allocation2] sm:$0xff] }
 0x1f9   : > { %v1210_v37 = vmax.f32 %v890_v26, 0.0  ;;  %v1212_v38 = vmax.f32 %v1083_v27, 0.0  ;;  %v894_v39 = vadd.f32 %v893_v35, %v3996_v59  ;;  %v1087_v40 = vadd.f32 %v1086_v36, %v4000_v60  ;;  %v3314_v35 = vld [vmem:[#allocation8 + $0xc] ss:$16 sps:$4 sm:$0xff] (!%p2933_p11)   ;;  %v3316_v36 = vld [vmem:[#allocation8] ss:$16 sps:$4 sm:$0xff] (!%p2933_p11)  }
 0x1fa   : > { %v1315_v41 = vadd.f32 %v1314_v16, %v1209_v30  ;;  %v1357_v42 = vadd.f32 %v1356_v17, %v1211_v32  ;;  %v1213_v43 = vmax.f32 %v892_v33, 0.0  ;;  %v1215_v44 = vmax.f32 %v1085_v34, 0.0  ;;  %v3312_v34 = vld [vmem:[#allocation8 + $0x4] ss:$16 sps:$4 sm:$0xff] (!%p2933_p11)   ;;  %2348 = vmatprep.subr.bf16.mxu1 (!%p2933_p11), %v3314_v35  ;;  %v3394_v35 = vld [vmem:[#allocation8 + $0x1a0] ss:$16 sps:$4 sm:$0xff] (!%p2933_p11)  }
 0x1fb   : > { %v1336_v45 = vadd.f32 %v1335_v18, %v1210_v37  ;;  %v1378_v46 = vadd.f32 %v1377_v19, %v1212_v38  ;;  %v1214_v47 = vmax.f32 %v894_v39, 0.0  ;;  %v1216_v48 = vmax.f32 %v1087_v40, 0.0  ;;  %2266 = vmatprep.subr.bf16.mxu0 (!%p2933_p11), %v3312_v34  ;;  %v3317_v37 = vld [vmem:[#allocation8 + $0x8] ss:$16 sps:$4 sm:$0xff] (!%p2933_p11)   ;;  %v3318_v38 = vld [vmem:[#allocation8 + $0x24] ss:$16 sps:$4 sm:$0xff] (!%p2933_p11)  }
 0x1fc   : > { %v1316_v49 = vadd.f32 %v1315_v41, %v1213_v43  ;;  %v1358_v57 = vadd.f32 %v1357_v42, %v1215_v44  ;;  %2267 = vmatpush1.bf16.msra.mxu0 (!%p2933_p11), %v3316_v36  ;;  %2349 = vmatpush1.bf16.msra.mxu1 (!%p2933_p11), %v3317_v37  ;;  %v3324_v39 = vld [vmem:[#allocation8 + $0x44] ss:$16 sps:$4 sm:$0xff] (!%p2933_p11)   ;;  %v3326_v40 = vld [vmem:[#allocation8 + $0x4c] ss:$16 sps:$4 sm:$0xff] (!%p2933_p11)   ;;  %v3328_v41 = vld [vmem:[#allocation8 + $0x40] ss:$16 sps:$4 sm:$0xff] (!%p2933_p11)  }
 0x1fd   : > { %v1337_v50 = vadd.f32 %v1336_v45, %v1214_v47  ;;  %v1379_v58 = vadd.f32 %v1378_v46, %v1216_v48  ;;  %2268 = vmatprep.subr.bf16.mxu0 (!%p2933_p11), %v3318_v38  ;;  %2350 = vmatprep.subr.bf16.mxu1 (!%p2933_p11), %v3320_v0  ;;  %v3329_v42 = vld [vmem:[#allocation8 + $0x48] ss:$16 sps:$4 sm:$0xff] (!%p2933_p11)   ;;  %v3330_v43 = vld [vmem:[#allocation8 + $0x64] ss:$16 sps:$4 sm:$0xff] (!%p2933_p11)   ;;  %v3332_v44 = vld [vmem:[#allocation8 + $0x6c] ss:$16 sps:$4 sm:$0xff] (!%p2933_p11)  }
 0x1fe   : > { %v1317_v54 = vrot.slane %v1316_v49, 4  ;;  %v1359_v61 = vrot.slane %v1358_v57, 4  ;;  %v3334_v45 = vld [vmem:[#allocation8 + $0x60] ss:$16 sps:$4 sm:$0xff] (!%p2933_p11)   ;;  %v3335_v46 = vld [vmem:[#allocation8 + $0x68] ss:$16 sps:$4 sm:$0xff] (!%p2933_p11)  }
 0x1ff   : > { %v1338_v62 = vrot.slane %v1337_v50, 4  ;;  %v1380_v63 = vrot.slane %v1379_v58, 4  ;;  %v3336_v47 = vld [vmem:[#allocation8 + $0x84] ss:$16 sps:$4 sm:$0xff] (!%p2933_p11)   ;;  %v3338_v48 = vld [vmem:[#allocation8 + $0x8c] ss:$16 sps:$4 sm:$0xff] (!%p2933_p11)  }
 0x200   : > { %v1318_v2 = vadd.f32 %v1317_v54, %v1316_v49  ;;  %v1360_v59 = vadd.f32 %v1359_v61, %v1358_v57  ;;  %2269 = vmatpush1.bf16.msra.mxu0 (!%p2933_p11), %v3322_v1  ;;  %v3340_v49 = vld [vmem:[#allocation8 + $0x80] ss:$16 sps:$4 sm:$0xff] (!%p2933_p11)   ;;  %v3341_v57 = vld [vmem:[#allocation8 + $0x88] ss:$16 sps:$4 sm:$0xff] (!%p2933_p11)   ;;  %v3396_v37 = vld [vmem:[#allocation8 + $0x1c4] ss:$16 sps:$4 sm:$0xff] (!%p2933_p11)  }
 0x201   : > { %v1339_v3 = vadd.f32 %v1338_v62, %v1337_v50  ;;  %v1381_v60 = vadd.f32 %v1380_v63, %v1379_v58  ;;  %2270 = vmatprep.subr.bf16.mxu0 (!%p2933_p11), %v3324_v39  ;;  %v3342_v50 = vld [vmem:[#allocation8 + $0xa4] ss:$16 sps:$4 sm:$0xff] (!%p2933_p11)   ;;  %v3344_v58 = vld [vmem:[#allocation8 + $0xac] ss:$16 sps:$4 sm:$0xff] (!%p2933_p11)   ;;  %v3346_v54 = vld [vmem:[#allocation8 + $0xa0] ss:$16 sps:$4 sm:$0xff] (!%p2933_p11)  }
 0x202   : > { %v1319_v4 = vrot.slane %v1318_v2, 2  ;;  %v1361_v5 = vrot.slane %v1360_v59, 2  ;;  %v3347_v61 = vld [vmem:[#allocation8 + $0xa8] ss:$16 sps:$4 sm:$0xff] (!%p2933_p11)   ;;  %v3348_v62 = vld [vmem:[#allocation8 + $0xc4] ss:$16 sps:$4 sm:$0xff] (!%p2933_p11)  }
 0x203   : > { %v1340_v6 = vrot.slane %v1339_v3, 2  ;;  %v1382_v7 = vrot.slane %v1381_v60, 2  ;;  %v3350_v63 = vld [vmem:[#allocation8 + $0xcc] ss:$16 sps:$4 sm:$0xff] (!%p2933_p11)   ;;  %v3395_v36 = vld [vmem:[#allocation8 + $0x1a8] ss:$16 sps:$4 sm:$0xff] (!%p2933_p11)  }
 0x204   : > { %v1320_v8 = vadd.f32 %v1319_v4, %v1318_v2  ;;  %v1362_v9 = vadd.f32 %v1361_v5, %v1360_v59  ;;  %2271 = vmatpush1.bf16.msra.mxu0 (!%p2933_p11), %v3328_v41  ;;  %v3352_v2 = vld [vmem:[#allocation8 + $0xc0] ss:$16 sps:$4 sm:$0xff] (!%p2933_p11)   ;;  %v3353_v59 = vld [vmem:[#allocation8 + $0xc8] ss:$16 sps:$4 sm:$0xff] (!%p2933_p11)   ;;  %v3398_v38 = vld [vmem:[#allocation8 + $0x1cc] ss:$16 sps:$4 sm:$0xff] (!%p2933_p11)  }
 0x205   : > { %v1341_v10 = vadd.f32 %v1340_v6, %v1339_v3  ;;  %v1383_v11 = vadd.f32 %v1382_v7, %v1381_v60  ;;  %2272 = vmatprep.subr.bf16.mxu0 (!%p2933_p11), %v3330_v43  ;;  %v3354_v3 = vld [vmem:[#allocation8 + $0xe4] ss:$16 sps:$4 sm:$0xff] (!%p2933_p11)   ;;  %v3356_v60 = vld [vmem:[#allocation8 + $0xec] ss:$16 sps:$4 sm:$0xff] (!%p2933_p11)   ;;  %v3358_v4 = vld [vmem:[#allocation8 + $0xe0] ss:$16 sps:$4 sm:$0xff] (!%p2933_p11)  }
 0x206   : > { %v1321_v13 = vrot.slane %v1320_v8, 1  ;;  %v1363_v14 = vrot.slane %v1362_v9, 1  ;;  %v3359_v5 = vld [vmem:[#allocation8 + $0xe8] ss:$16 sps:$4 sm:$0xff] (!%p2933_p11)   ;;  %v3360_v6 = vld [vmem:[#allocation8 + $0x104] ss:$16 sps:$4 sm:$0xff] (!%p2933_p11)  }
 0x207   : > { %v1342_v15 = vrot.slane %v1341_v10, 1  ;;  %v1384_v16 = vrot.slane %v1383_v11, 1  ;;  %v3362_v7 = vld [vmem:[#allocation8 + $0x10c] ss:$16 sps:$4 sm:$0xff] (!%p2933_p11)   ;;  %v3400_v1 = vld [vmem:[#allocation8 + $0x1c0] ss:$16 sps:$4 sm:$0xff] (!%p2933_p11)  }
 0x208   : > { %v1322_v17 = vadd.f32 %v1321_v13, %v1320_v8  ;;  %v1364_v18 = vadd.f32 %v1363_v14, %v1362_v9  ;;  %2273 = vmatpush1.bf16.msra.mxu0 (!%p2933_p11), %v3334_v45  ;;  %v3364_v8 = vld [vmem:[#allocation8 + $0x100] ss:$16 sps:$4 sm:$0xff] (!%p2933_p11)   ;;  %v3365_v9 = vld [vmem:[#allocation8 + $0x108] ss:$16 sps:$4 sm:$0xff] (!%p2933_p11)   ;;  %v3402_v39 = vld [vmem:[#allocation8 + $0x1e4] ss:$16 sps:$4 sm:$0xff] (!%p2933_p11)  }
 0x209   : > { %v1343_v19 = vadd.f32 %v1342_v15, %v1341_v10  ;;  %v1385_v20 = vadd.f32 %v1384_v16, %v1383_v11  ;;  %2274 = vmatprep.subr.bf16.mxu0 (!%p2933_p11), %v3336_v47  ;;  %v3366_v10 = vld [vmem:[#allocation8 + $0x124] ss:$16 sps:$4 sm:$0xff] (!%p2933_p11)   ;;  %v3368_v11 = vld [vmem:[#allocation8 + $0x12c] ss:$16 sps:$4 sm:$0xff] (!%p2933_p11)   ;;  %v3370_v13 = vld [vmem:[#allocation8 + $0x120] ss:$16 sps:$4 sm:$0xff] (!%p2933_p11)  }
 0x20a   : > { %v3371_v14 = vld [vmem:[#allocation8 + $0x128] ss:$16 sps:$4 sm:$0xff] (!%p2933_p11)   ;;  %v3372_v15 = vld [vmem:[#allocation8 + $0x144] ss:$16 sps:$4 sm:$0xff] (!%p2933_p11)   ;;  %v3374_v16 = vld [vmem:[#allocation8 + $0x14c] ss:$16 sps:$4 sm:$0xff] (!%p2933_p11)  }
 0x20b   : > { %v1411_v21 = vcombine.low %v1322_v17, %v1343_v19  ;;  %v1412_v22 = vcombine.low %v1364_v18, %v1385_v20  ;;  %v3376_v17 = vld [vmem:[#allocation8 + $0x140] ss:$16 sps:$4 sm:$0xff] (!%p2933_p11)   ;;  %v3377_v18 = vld [vmem:[#allocation8 + $0x148] ss:$16 sps:$4 sm:$0xff] (!%p2933_p11)   ;;  %v3378_v19 = vld [vmem:[#allocation8 + $0x164] ss:$16 sps:$4 sm:$0xff] (!%p2933_p11)  }
 0x20c   : > { %2275 = vmatpush1.bf16.msra.mxu0 (!%p2933_p11), %v3340_v49  ;;  %v3380_v20 = vld [vmem:[#allocation8 + $0x16c] ss:$16 sps:$4 sm:$0xff] (!%p2933_p11)   ;;  %v3407_v43 = vld [vmem:[#allocation8 + $0x1e8] ss:$16 sps:$4 sm:$0xff] (!%p2933_p11)   ;;  %v3408_v47 = vld [vmem:[#allocation8 + $0x200] ss:$16 sps:$4 sm:$0xff] (!%p2933_p11)  }
 0x20d   : > { %v1419_v23 = vrot.slane %v1411_v21, %v4067_v31  ;;  %v1426_v24 = vrot.slane %v1412_v22, %v4067_v31  ;;  %2276 = vmatprep.subr.bf16.mxu0 (!%p2933_p11), %v3342_v50  ;;  %v3382_v22 = vld [vmem:[#allocation8 + $0x160] ss:$16 sps:$4 sm:$0xff] (!%p2933_p11)   ;;  %v3413_v45 = vld [vmem:[#allocation8 + $0x20c] ss:$16 sps:$4 sm:$0xff] (!%p2933_p11)   ;;  %v3411_v49 = vld [vmem:[#allocation8 + $0x208] ss:$16 sps:$4 sm:$0xff] (!%p2933_p11)  }
 0x20f   : > { %v1427_v25 = vcombine.low %v1419_v23, %v1426_v24  ;;  %v3383_v24 = vld [vmem:[#allocation8 + $0x168] ss:$16 sps:$4 sm:$0xff] (!%p2933_p11)  }
 0x210   : > { %2277 = vmatpush1.bf16.msra.mxu0 (!%p2933_p11), %v3346_v54  ;;  %v3417_v54 = vld [vmem:[#allocation8 + $0x228] ss:$16 sps:$4 sm:$0xff] (!%p2933_p11)  }
 0x211   : > { %v1432_v26 = vrot.slane %v1427_v25, 7  ;;  %2278 = vmatprep.subr.bf16.mxu0 (!%p2933_p11), %v3348_v62  ;;  %v3384_v25 = vld [vmem:[#allocation8 + $0x184] ss:$16 sps:$4 sm:$0xff] (!%p2933_p11)   ;;  %v3425_v62 = vld [vmem:[#allocation8 + $0x24c] ss:$16 sps:$4 sm:$0xff] (!%p2933_p11)  }
 0x213   : > { %v1434_v27 = vsel %vm1433_vm0, %v1432_v26, %v1410_v12  ;;  %1447 = sbr.rel (%p2933_p11) target bundleno = 1093 (0x445), region = 72  ;;  %v3323_v12 = vld [vmem:[#allocation8 + $0x28] ss:$16 sps:$4 sm:$0xff] (!%p2933_p11)  }
 0x214   : > { %v1436_v29 = vsel %vm1435_vm1, %v1432_v26, %v1434_v27  ;;  %2351 = vmatpush1.bf16.msra.mxu1 (!%p2933_p11), %v3323_v12  ;;  %2279 = vmatpush1.bf16.msra.mxu0 (!%p2933_p11), %v3352_v2  ;;  %v3401_v12 = vld [vmem:[#allocation8 + $0x1c8] ss:$16 sps:$4 sm:$0xff] (!%p2933_p11)  }
 0x215   : > { %v1438_v30 = vsel %vm1437_vm2, %v1432_v26, %v1436_v29  ;;  %2352 = vmatprep.subr.bf16.mxu1 (!%p2933_p11), %v3326_v40  ;;  %2280 = vmatprep.subr.bf16.mxu0 (!%p2933_p11), %v3354_v3  ;;  %v3404_v40 = vld [vmem:[#allocation8 + $0x1ec] ss:$16 sps:$4 sm:$0xff] (!%p2933_p11)   ;;  %v3423_v2 = vld [vmem:[#allocation8 + $0x248] ss:$16 sps:$4 sm:$0xff] (!%p2933_p11)  }
 0x216   : > { %v1440_v32 = vsel %vm1439_vm3, %v1432_v26, %v1438_v30  ;;  %v3386_v26 = vld [vmem:[#allocation8 + $0x18c] ss:$16 sps:$4 sm:$0xff] (!%p2933_p11)   ;;  %v3389_v30 = vld [vmem:[#allocation8 + $0x188] ss:$16 sps:$4 sm:$0xff] (!%p2933_p11)  }
 0x217   : > { %v1442_v33 = vadd.f32 %v1440_v32, %v1217_v28  ;;  %v3388_v28 = vld [vmem:[#allocation8 + $0x180] ss:$16 sps:$4 sm:$0xff] (!%p2933_p11)   ;;  %v3390_v32 = vld [vmem:[#allocation8 + $0x1a4] ss:$16 sps:$4 sm:$0xff] (!%p2933_p11)   ;;  %v3431_v3 = vld [vmem:[#allocation8 + $0x26c] ss:$16 sps:$4 sm:$0xff] (!%p2933_p11)  }
 0x218   : > { %2353 = vmatpush1.bf16.msra.mxu1 (!%p2933_p11), %v3329_v42  ;;  %2281 = vmatpush1.bf16.msra.mxu0 (!%p2933_p11), %v3358_v4  ;;  %v3406_v42 = vld [vmem:[#allocation8 + $0x1e0] ss:$16 sps:$4 sm:$0xff] (!%p2933_p11)   ;;  %v3429_v4 = vld [vmem:[#allocation8 + $0x268] ss:$16 sps:$4 sm:$0xff] (!%p2933_p11)  }
 0x219   : > { %1443 = vst [vmem:[#allocation2] sm:$0xff] %v1442_v33  ;;  %2354 = vmatprep.subr.bf16.mxu1 (!%p2933_p11), %v3332_v44  ;;  %2282 = vmatprep.subr.bf16.mxu0 (!%p2933_p11), %v3360_v6  ;;  %v3392_v33 = vld [vmem:[#allocation8 + $0x1ac] ss:$16 sps:$4 sm:$0xff] (!%p2933_p11)   ;;  %v3410_v44 = vld [vmem:[#allocation8 + $0x204] ss:$16 sps:$4 sm:$0xff] (!%p2933_p11)  }
 0x21a   : > { %v3437_v6 = vld [vmem:[#allocation8 + $0x28c] ss:$16 sps:$4 sm:$0xff]  }
 0x21c   : > { %2355 = vmatpush1.bf16.msra.mxu1 %v3335_v46  ;;  %2283 = vmatpush1.bf16.msra.mxu0 %v3364_v8  ;;  %v3435_v8 = vld [vmem:[#allocation8 + $0x288] ss:$16 sps:$4 sm:$0xff]  }
 0x21d   : > { %2356 = vmatprep.subr.bf16.mxu1 %v3338_v48  ;;  %2284 = vmatprep.subr.bf16.mxu0 %v3366_v10  ;;  %v3443_v10 = vld [vmem:[#allocation8 + $0x2ac] ss:$16 sps:$4 sm:$0xff]  }
 0x220   : > { %2357 = vmatpush1.bf16.msra.mxu1 %v3341_v57  ;;  %2285 = vmatpush1.bf16.msra.mxu0 %v3370_v13  ;;  %v1448_v21 = vld [vmem:[#allocation2] sm:$0xff] }
 0x221   : > { %2358 = vmatprep.subr.bf16.mxu1 %v3344_v58  ;;  %2286 = vmatprep.subr.bf16.mxu0 %v3372_v15  ;;  %v1449_v23 = vmul.f32 0.00390625, %v1448_v21  ;;  %v3419_v57 = vld [vmem:[#allocation8 + $0x22c] ss:$16 sps:$4 sm:$0xff]   ;;  %v3414_v58 = vld [vmem:[#allocation8 + $0x220] ss:$16 sps:$4 sm:$0xff]  }
 0x222   : > { %v3441_v13 = vld [vmem:[#allocation8 + $0x2a8] ss:$16 sps:$4 sm:$0xff]   ;;  %v3449_v15 = vld [vmem:[#allocation8 + $0x2cc] ss:$16 sps:$4 sm:$0xff]  }
 0x223   : > { %v1458_v27 = vrot.slane %v1449_v23, %v4067_v31  ;;  %v1451_v0 = vcombine.high %v1449_v23, %v1449_v23  ;;  %v3453_v21 = vld [vmem:[#allocation8 + $0x2e8] ss:$16 sps:$4 sm:$0xff]   ;;  %v3461_v23 = vld [vmem:[#allocation8 + $0x30c] ss:$16 sps:$4 sm:$0xff]  }
 0x224   : > { %2359 = vmatpush1.bf16.msra.mxu1 %v3347_v61  ;;  %2287 = vmatpush1.bf16.msra.mxu0 %v3376_v17  ;;  %v3422_v61 = vld [vmem:[#allocation8 + $0x244] ss:$16 sps:$4 sm:$0xff]   ;;  %v3447_v17 = vld [vmem:[#allocation8 + $0x2c8] ss:$16 sps:$4 sm:$0xff]  }
 0x225   : > { %2360 = vmatprep.subr.bf16.mxu1 %v3350_v63  ;;  %2288 = vmatprep.subr.bf16.mxu0 %v3378_v19  ;;  %v1466_v29 = vcombine.high %v1458_v27, %v1458_v27  ;;  %v4149_v41 = vrot.slane %v1451_v0, %v4067_v31  ;;  %v1472_v48 = vpack.c.bf16 %v1458_v27, %v1458_v27  ;;  %v3416_v31 = vld [vmem:[#allocation8 + $0x224] ss:$16 sps:$4 sm:$0xff]   ;;  %v3420_v63 = vld [vmem:[#allocation8 + $0x240] ss:$16 sps:$4 sm:$0xff]   ;;  %v3455_v19 = vld [vmem:[#allocation8 + $0x2ec] ss:$16 sps:$4 sm:$0xff]  }
 0x226   : > { %v3467_v27 = vld [vmem:[#allocation8 + $0x32c] ss:$16 sps:$4 sm:$0xff]   ;;  %v3482_v0 = vld [vmem:[#allocation8 + $0x384] ss:$16 sps:$4 sm:$0xff]  }
 0x227   : > { %v1473_v34 = vpack.c.bf16 %v1466_v29, %v1466_v29  ;;  %v1467_v46 = vcombine.high %v4149_v41, %v4149_v41  ;;  %v3465_v29 = vld [vmem:[#allocation8 + $0x328] ss:$16 sps:$4 sm:$0xff]  }
 0x228   : > { %2361 = vmatpush1.bf16.msra.mxu1 %v3353_v59  ;;  %2289 = vmatpush1.bf16.msra.mxu0 %v3382_v22  ;;  %v3428_v59 = vld [vmem:[#allocation8 + $0x264] ss:$16 sps:$4 sm:$0xff]  }
 0x229   : > { %2362 = vmatprep.subr.bf16.mxu1 %v3356_v60  ;;  %2290 = vmatprep.subr.bf16.mxu0 %v3384_v25  ;;  %v1475_v50 = vpack.c.bf16 %v1467_v46, %v1467_v46  ;;  %v3426_v60 = vld [vmem:[#allocation8 + $0x260] ss:$16 sps:$4 sm:$0xff]   ;;  %v3458_v22 = vld [vmem:[#allocation8 + $0x304] ss:$16 sps:$4 sm:$0xff]   ;;  %v3459_v25 = vld [vmem:[#allocation8 + $0x308] ss:$16 sps:$4 sm:$0xff]  }
 0x22a   : > { %2298 = vmatprep.mubr.bf16.mxu0 %v1473_v34  ;;  %2380 = vmatprep.mubr.bf16.mxu1 %v1473_v34  ;;  %v3471_v34 = vld [vmem:[#allocation8 + $0x348] ss:$16 sps:$4 sm:$0xff]   ;;  %v3497_v46 = vld [vmem:[#allocation8 + $0x3cc] ss:$16 sps:$4 sm:$0xff]  }
 0x22c   : > { %2363 = vmatpush1.bf16.msra.mxu1 %v3359_v5  ;;  %2291 = vmatpush1.bf16.msra.mxu0 %v3388_v28  ;;  %v3434_v5 = vld [vmem:[#allocation8 + $0x284] ss:$16 sps:$4 sm:$0xff]   ;;  %v3462_v28 = vld [vmem:[#allocation8 + $0x320] ss:$16 sps:$4 sm:$0xff]  }
 0x22d   : > { %2364 = vmatprep.subr.bf16.mxu1 %v3362_v7  ;;  %2292 = vmatprep.subr.bf16.mxu0 %v3390_v32  ;;  %v3432_v7 = vld [vmem:[#allocation8 + $0x280] ss:$16 sps:$4 sm:$0xff]   ;;  %v3473_v32 = vld [vmem:[#allocation8 + $0x34c] ss:$16 sps:$4 sm:$0xff]  }
 0x230   : > { %2365 = vmatpush1.bf16.msra.mxu1 %v3365_v9  ;;  %2293 = vmatpush1.bf16.msra.mxu0 %v3394_v35  ;;  %v3440_v9 = vld [vmem:[#allocation8 + $0x2a4] ss:$16 sps:$4 sm:$0xff]  }
 0x231   : > { %2366 = vmatprep.subr.bf16.mxu1 %v3368_v11  ;;  %2294 = vmatprep.subr.bf16.mxu0 %v3396_v37  ;;  %v3438_v11 = vld [vmem:[#allocation8 + $0x2a0] ss:$16 sps:$4 sm:$0xff]   ;;  %v3476_v35 = vld [vmem:[#allocation8 + $0x364] ss:$16 sps:$4 sm:$0xff]  }
 0x232   : > { %v3474_v37 = vld [vmem:[#allocation8 + $0x360] ss:$16 sps:$4 sm:$0xff]  }
 0x234   : > { %2367 = vmatpush1.bf16.msra.mxu1 %v3371_v14  ;;  %2295 = vmatpush1.bf16.msra.mxu0 %v3400_v1  ;;  %v3446_v14 = vld [vmem:[#allocation8 + $0x2c4] ss:$16 sps:$4 sm:$0xff]   ;;  %v3485_v1 = vld [vmem:[#allocation8 + $0x38c] ss:$16 sps:$4 sm:$0xff]  }
 0x235   : > { %2368 = vmatprep.subr.bf16.mxu1 %v3374_v16  ;;  %2296 = vmatprep.subr.bf16.mxu0 %v3402_v39  ;;  %v3444_v16 = vld [vmem:[#allocation8 + $0x2c0] ss:$16 sps:$4 sm:$0xff]   ;;  %v3483_v39 = vld [vmem:[#allocation8 + $0x388] ss:$16 sps:$4 sm:$0xff]  }
 0x238   : > { %2369 = vmatpush1.bf16.msra.mxu1 %v3377_v18  ;;  %2297 = vmatpush1.bf16.msra.mxu0 %v3406_v42  ;;  %v3452_v18 = vld [vmem:[#allocation8 + $0x2e4] ss:$16 sps:$4 sm:$0xff]   ;;  %v3491_v42 = vld [vmem:[#allocation8 + $0x3ac] ss:$16 sps:$4 sm:$0xff]  }
 0x239   : > { %2370 = vmatprep.subr.bf16.mxu1 %v3380_v20  ;;  %2307 = vmatprep.subr.bf16.mxu0 %v3410_v44  ;;  %v3450_v20 = vld [vmem:[#allocation8 + $0x2e0] ss:$16 sps:$4 sm:$0xff]   ;;  %v3489_v44 = vld [vmem:[#allocation8 + $0x3a8] ss:$16 sps:$4 sm:$0xff]  }
 0x23b   : > { %2299 = vmatmul.mubr.bf16.vlgmr.msra.gmra.mrb[0].mxu0 %v1472_v48 }
 0x23c   : > { %2371 = vmatpush1.bf16.msra.mxu1 %v3383_v24  ;;  %2308 = vmatpush1.bf16.msra.mxu0 %v3408_v47  ;;  %v3456_v24 = vld [vmem:[#allocation8 + $0x300] ss:$16 sps:$4 sm:$0xff]  }
 0x23d   : > { %2372 = vmatprep.subr.bf16.mxu1 %v3386_v26  ;;  %2309 = vmatprep.subr.bf16.mxu0 %v3416_v31  ;;  %v3464_v26 = vld [vmem:[#allocation8 + $0x324] ss:$16 sps:$4 sm:$0xff]   ;;  %v3492_v47 = vld [vmem:[#allocation8 + $0x3c0] ss:$16 sps:$4 sm:$0xff]   ;;  %v3503_v31 = vld [vmem:[#allocation8 + $0x3ec] ss:$16 sps:$4 sm:$0xff]  }
 0x23e   : > { %2339 = vmatprep.mubr.bf16.mxu0 %v1475_v50 }
 0x240   : > { %2373 = vmatpush1.bf16.msra.mxu1 %v3389_v30  ;;  %2310 = vmatpush1.bf16.msra.mxu0 %v3414_v58  ;;  %v3470_v30 = vld [vmem:[#allocation8 + $0x344] ss:$16 sps:$4 sm:$0xff]  }
 0x241   : > { %2374 = vmatprep.subr.bf16.mxu1 %v3392_v33  ;;  %2311 = vmatprep.subr.bf16.mxu0 %v3422_v61  ;;  %v3468_v33 = vld [vmem:[#allocation8 + $0x340] ss:$16 sps:$4 sm:$0xff]   ;;  %v1474_v61 = vpack.c.bf16 %v4149_v41, %v4149_v41 }
 0x242   : > { %v3504_v58 = vld [vmem:[#allocation9 + $0x40] sm:$0xff]   ;;  %v3514_v41 = vld [vmem:[#allocation9 + $0x10] sm:$0xff]  }
 0x244   : > { %2375 = vmatpush1.bf16.msra.mxu1 %v3395_v36  ;;  %2312 = vmatpush1.bf16.msra.mxu0 %v3420_v63  ;;  %v3479_v36 = vld [vmem:[#allocation8 + $0x36c] ss:$16 sps:$4 sm:$0xff]   ;;  %v3507_v63 = vld [vmem:[#allocation9 + $0x80] sm:$0xff]  }
 0x245   : > { %2376 = vmatprep.subr.bf16.mxu1 %v3398_v38  ;;  %2313 = vmatprep.subr.bf16.mxu0 %v3428_v59  ;;  %v3477_v38 = vld [vmem:[#allocation8 + $0x368] ss:$16 sps:$4 sm:$0xff]  }
 0x246   : > { %v3509_v59 = vld [vmem:[#allocation9 + $0xc8] sm:$0xff]  }
 0x248   : > { %2377 = vmatpush1.bf16.msra.mxu1 %v3401_v12  ;;  %2314 = vmatpush1.bf16.msra.mxu0 %v3426_v60  ;;  %v3480_v12 = vld [vmem:[#allocation8 + $0x380] ss:$16 sps:$4 sm:$0xff]   ;;  %v3511_v60 = vld [vmem:[#allocation9 + $0x88] sm:$0xff]  }
 0x249   : > { %2378 = vmatprep.subr.bf16.mxu1 %v3404_v40  ;;  %2315 = vmatprep.subr.bf16.mxu0 %v3434_v5  ;;  %v3488_v40 = vld [vmem:[#allocation8 + $0x3a4] ss:$16 sps:$4 sm:$0xff]  }
 0x24a   : > { %v3513_v5 = vld [vmem:[#allocation9 + $0xd0] sm:$0xff]  }
 0x24c   : > { %2379 = vmatpush1.bf16.msra.mxu1 %v3407_v43  ;;  %2316 = vmatpush1.bf16.msra.mxu0 %v3432_v7  ;;  %v3486_v43 = vld [vmem:[#allocation8 + $0x3a0] ss:$16 sps:$4 sm:$0xff]   ;;  %v3516_v7 = vld [vmem:[#allocation9 + $0x58] sm:$0xff]  }
 0x24d   : > { %2389 = vmatprep.subr.bf16.mxu1 %v3413_v45  ;;  %2317 = vmatprep.subr.bf16.mxu0 %v3440_v9  ;;  %v3494_v45 = vld [vmem:[#allocation8 + $0x3c4] ss:$16 sps:$4 sm:$0xff]   ;;  %v3518_v9 = vld [vmem:[#allocation9 + $0x18] sm:$0xff]  }
 0x24f   : > { %2381 = vmatmul.mubr.bf16.vlgmr.msra.gmra.mrb[0].mxu1 %v1472_v48  ;;  %v3495_v48 = vld [vmem:[#allocation8 + $0x3c8] ss:$16 sps:$4 sm:$0xff]  }
 0x250   : > { %2390 = vmatpush1.bf16.msra.mxu1 %v3411_v49  ;;  %2421 = vmatprep.mubr.bf16.mxu1 %v1475_v50  ;;  %v3500_v49 = vld [vmem:[#allocation8 + $0x3e4] ss:$16 sps:$4 sm:$0xff]   ;;  %v3501_v50 = vld [vmem:[#allocation8 + $0x3e8] ss:$16 sps:$4 sm:$0xff]  }
 0x251   : > { %2391 = vmatprep.subr.bf16.mxu1 %v3419_v57  ;;  %2318 = vmatpush1.bf16.msra.mxu0 %v3438_v11  ;;  %v3498_v57 = vld [vmem:[#allocation8 + $0x3e0] ss:$16 sps:$4 sm:$0xff]  }
 0x252   : > { %2319 = vmatprep.subr.bf16.mxu0 %v3446_v14  ;;  %v3520_v11 = vld [vmem:[#allocation9 + $0x60] sm:$0xff]  }
 0x253   : > { %v3522_v14 = vld [vmem:[#allocation9 + $0x20] sm:$0xff]  }
 0x254   : > { %2392 = vmatpush1.bf16.msra.mxu1 %v3417_v54  ;;  %v3505_v54 = vld [vmem:[#allocation9 + $0xc0] sm:$0xff]  }
 0x255   : > { %2393 = vmatprep.subr.bf16.mxu1 %v3425_v62  ;;  %2320 = vmatpush1.bf16.msra.mxu0 %v3444_v16  ;;  %v3506_v62 = vld [vmem:[#allocation9] sm:$0xff]   ;;  %v3524_v16 = vld [vmem:[#allocation9 + $0x68] sm:$0xff]  }
 0x256   : > { %2321 = vmatprep.subr.bf16.mxu0 %v3452_v18  ;;  %v3526_v18 = vld [vmem:[#allocation9 + $0x28] sm:$0xff]  }
 0x258   : > { %2394 = vmatpush1.bf16.msra.mxu1 %v3423_v2  ;;  %v3508_v2 = vld [vmem:[#allocation9 + $0x48] sm:$0xff]  }
 0x259   : > { %2395 = vmatprep.subr.bf16.mxu1 %v3431_v3  ;;  %2322 = vmatpush1.bf16.msra.mxu0 %v3450_v20  ;;  %v3510_v3 = vld [vmem:[#allocation9 + $0x8] sm:$0xff]   ;;  %v3528_v20 = vld [vmem:[#allocation9 + $0x70] sm:$0xff]  }
 0x25a   : > { %2323 = vmatprep.subr.bf16.mxu0 %v3458_v22  ;;  %v3530_v22 = vld [vmem:[#allocation9 + $0x30] sm:$0xff]  }
 0x25c   : > { %2396 = vmatpush1.bf16.msra.mxu1 %v3429_v4  ;;  %v3512_v4 = vld [vmem:[#allocation9 + $0x50] sm:$0xff]  }
 0x25d   : > { %2397 = vmatprep.subr.bf16.mxu1 %v3437_v6  ;;  %2324 = vmatpush1.bf16.msra.mxu0 %v3456_v24  ;;  %v3515_v6 = vld [vmem:[#allocation9 + $0x90] sm:$0xff]   ;;  %v3532_v24 = vld [vmem:[#allocation9 + $0x78] sm:$0xff]  }
 0x25e   : > { %2325 = vmatprep.subr.bf16.mxu0 %v3464_v26  ;;  %v3534_v26 = vld [vmem:[#allocation9 + $0x38] sm:$0xff]  }
 0x260   : > { %2398 = vmatpush1.bf16.msra.mxu1 %v3435_v8  ;;  %v3517_v8 = vld [vmem:[#allocation9 + $0xd8] sm:$0xff]  }
 0x261   : > { %2399 = vmatprep.subr.bf16.mxu1 %v3443_v10  ;;  %2326 = vmatpush1.bf16.msra.mxu0 %v3462_v28  ;;  %v3519_v10 = vld [vmem:[#allocation9 + $0x98] sm:$0xff]  }
 0x262   : > { %2327 = vmatprep.subr.bf16.mxu0 %v3470_v30  ;;  %v1604_v28 = vld [vmem:[%s4209_s4] sm:$0xf] }
 0x263   : > { %v1617_v30 = vrot.slane %v1604_v28, %v437_v53 }
 0x264   : > { %2400 = vmatpush1.bf16.msra.mxu1 %v3441_v13  ;;  %v3521_v13 = vld [vmem:[#allocation9 + $0xe0] sm:$0xff]  }
 0x265   : > { %2401 = vmatprep.subr.bf16.mxu1 %v3449_v15  ;;  %2328 = vmatpush1.bf16.msra.mxu0 %v3468_v33  ;;  %v3523_v15 = vld [vmem:[#allocation9 + $0xa0] sm:$0xff]   ;;  %v1621_v33 = vrot.slane %v1604_v28, %v441_v56 }
 0x266   : > { %2329 = vmatprep.subr.bf16.mxu0 %v3476_v35 }
 0x268   : > { %2402 = vmatpush1.bf16.msra.mxu1 %v3447_v17  ;;  %v3525_v17 = vld [vmem:[#allocation9 + $0xe8] sm:$0xff]  }
 0x269   : > { %2403 = vmatprep.subr.bf16.mxu1 %v3455_v19  ;;  %2330 = vmatpush1.bf16.msra.mxu0 %v3474_v37  ;;  %v3527_v19 = vld [vmem:[#allocation9 + $0xa8] sm:$0xff]  }
 0x26a   : > { %2331 = vmatprep.subr.bf16.mxu0 %v3482_v0 }
 0x26c   : > { %2404 = vmatpush1.bf16.msra.mxu1 %v3453_v21  ;;  %v3529_v21 = vld [vmem:[#allocation9 + $0xf0] sm:$0xff]  }
 0x26d   : > { %2405 = vmatprep.subr.bf16.mxu1 %v3461_v23  ;;  %2332 = vmatpush1.bf16.msra.mxu0 %v3480_v12  ;;  %v3531_v23 = vld [vmem:[#allocation9 + $0xb0] sm:$0xff]  }
 0x26e   : > { %2333 = vmatprep.subr.bf16.mxu0 %v3488_v40 }
 0x270   : > { %2406 = vmatpush1.bf16.msra.mxu1 %v3459_v25  ;;  %v3533_v25 = vld [vmem:[#allocation9 + $0xf8] sm:$0xff]  }
 0x271   : > { %2407 = vmatprep.subr.bf16.mxu1 %v3467_v27  ;;  %2334 = vmatpush1.bf16.msra.mxu0 %v3486_v43  ;;  %v3535_v27 = vld [vmem:[#allocation9 + $0xb8] sm:$0xff]  }
 0x272   : > { %2335 = vmatprep.subr.bf16.mxu0 %v3494_v45 }
 0x274   : > { %2408 = vmatpush1.bf16.msra.mxu1 %v3465_v29  ;;  %v1609_v29 = vrot.slane %v1604_v28, %v429_v52 }
 0x275   : > { %2409 = vmatprep.subr.bf16.mxu1 %v3473_v32  ;;  %2336 = vmatpush1.bf16.msra.mxu0 %v3492_v47  ;;  %v1613_v32 = vrot.slane %v1604_v28, %v433_v55 }
 0x276   : > { %2337 = vmatprep.subr.bf16.mxu0 %v3500_v49  ;;  %v3062_v49 = vld [vmem:[%s4211_s6] ss:$0 sm:$0xff] }
 0x278   : > { %2410 = vmatpush1.bf16.msra.mxu1 %v3471_v34 }
 0x279   : > { %2411 = vmatprep.subr.bf16.mxu1 %v3479_v36  ;;  %2338 = vmatpush1.bf16.msra.mxu0 %v3498_v57 }
 0x27a   : > { %3100 = vmatprep.subr.bf16.mxu0 %v3504_v58 }
 0x27c   : > { %2412 = vmatpush1.bf16.msra.mxu1 %v3477_v38  ;;  %2340 = vmatmul.mubr.bf16.vlgmr.msra.gmra.mrb[0].mxu0 %v1474_v61 }
 0x27d   : > { %2413 = vmatprep.subr.bf16.mxu1 %v3485_v1  ;;  %3101 = vmatpush3.bf16.msra.mxu0 %v3506_v62 }
 0x27e   : > { %3102 = vmatprep.subr.bf16.mxu0 %v3508_v2 }
 0x280   : > { %2414 = vmatpush1.bf16.msra.mxu1 %v3483_v39 }
 0x281   : > { %2415 = vmatprep.subr.bf16.mxu1 %v3491_v42  ;;  %3103 = vmatpush3.bf16.msra.mxu0 %v3510_v3 }
 0x282   : > { %3104 = vmatprep.subr.bf16.mxu0 %v3512_v4 }
 0x284   : > { %2416 = vmatpush1.bf16.msra.mxu1 %v3489_v44 }
 0x285   : > { %2417 = vmatprep.subr.bf16.mxu1 %v3497_v46  ;;  %3105 = vmatpush3.bf16.msra.mxu0 %v3514_v41 }
 0x286   : > { %3106 = vmatprep.subr.bf16.mxu0 %v3516_v7 }
 0x288   : > { %2418 = vmatpush1.bf16.msra.mxu1 %v3495_v48 }
 0x289   : > { %2419 = vmatprep.subr.bf16.mxu1 %v3503_v31  ;;  %3107 = vmatpush3.bf16.msra.mxu0 %v3518_v9 }
 0x28a   : > { %3108 = vmatprep.subr.bf16.mxu0 %v3520_v11 }
 0x28c   : > { %2420 = vmatpush1.bf16.msra.mxu1 %v3501_v50 }
 0x28d   : > { %3122 = vmatprep.subr.bf16.mxu1 %v3505_v54  ;;  %3109 = vmatpush3.bf16.msra.mxu0 %v3522_v14 }
 0x28e   : > { %3110 = vmatprep.subr.bf16.mxu0 %v3524_v16 }
 0x28f   : > { %2422 = vmatmul.mubr.bf16.vlgmr.msra.gmra.mrb[0].mxu1 %v1474_v61 }
 0x290   : > { %3123 = vmatpush3.bf16.msra.mxu1 %v3507_v63 }
 0x291   : > { %3124 = vmatprep.subr.bf16.mxu1 %v3509_v59  ;;  %3111 = vmatpush3.bf16.msra.mxu0 %v3526_v18 }
 0x292   : > { %3112 = vmatprep.subr.bf16.mxu0 %v3528_v20 }
 0x294   : > { %3125 = vmatpush3.bf16.msra.mxu1 %v3511_v60 }
 0x295   : > { %3126 = vmatprep.subr.bf16.mxu1 %v3513_v5  ;;  %3113 = vmatpush3.bf16.msra.mxu0 %v3530_v22 }
 0x296   : > { %3114 = vmatprep.subr.bf16.mxu0 %v3532_v24 }
 0x298   : > { %3127 = vmatpush3.bf16.msra.mxu1 %v3515_v6 }
 0x299   : > { %3128 = vmatprep.subr.bf16.mxu1 %v3517_v8  ;;  %3115 = vmatpush3.bf16.msra.mxu0 %v3534_v26 }
 0x29c   : > { %3129 = vmatpush3.bf16.msra.mxu1 %v3519_v10 }
 0x29d   : > { %3130 = vmatprep.subr.bf16.mxu1 %v3521_v13 }
 0x2a0   : > { %3131 = vmatpush3.bf16.msra.mxu1 %v3523_v15 }
 0x2a1   : > { %3132 = vmatprep.subr.bf16.mxu1 %v3525_v17 }
 0x2a4   : > { %3133 = vmatpush3.bf16.msra.mxu1 %v3527_v19 }
 0x2a5   : > { %3134 = vmatprep.subr.bf16.mxu1 %v3529_v21 }
 0x2a8   : > { %3135 = vmatpush3.bf16.msra.mxu1 %v3531_v23 }
 0x2a9   : > { %3136 = vmatprep.subr.bf16.mxu1 %v3533_v25 }
 0x2ac   : > { %3137 = vmatpush3.bf16.msra.mxu1 %v3535_v27 }
 0x34f   : > { %v2341_v34 = vpop.f32.mrb[0].mxu0 }
 0x350   : > { %v3144_v36 = vadd.f32 %v2341_v34, %v1609_v29  ;;  %v2343_v38 = vpop.f32.mrb[1].mxu0 }
 0x351   : > { %v3145_v1 = vadd.f32 %v2343_v38, %v1613_v32  ;;  %v2345_v39 = vpop.f32.mrb[2].mxu0 }
 0x352   : > { %v2430_v52 = vmax.f32 %v3144_v36, 0.0  ;;  %v2346_v43 = vpop.f32.mrb[3].mxu0 }
 0x353   : > { %v2431_v44 = vmax.f32 %v3145_v1, 0.0 }
 0x354   : > { %v2434_v51 = vpack.c.bf16 %v2430_v52, %v2430_v52 }
 0x355   : > { %v2435_v55 = vpack.c.bf16 %v2431_v44, %v2431_v44 }
 0x357   : > { %2733 = vmatprep.mubr.bf16.mxu0 %v2435_v55 }
 0x358   : > { %2734 = vmatmul.mubr.bf16.vlgmr.msra.gmra.mrb[4].mxu0 %v2434_v51 }
 0x362   : > { %v2423_v35 = vpop.f32.mrb[0].mxu1 }
 0x363   : > { %v3146_v37 = vadd.f32 %v2423_v35, %v1617_v30  ;;  %v2425_v0 = vpop.f32.mrb[1].mxu1 }
 0x364   : > { %v3147_v12 = vadd.f32 %v2425_v0, %v1621_v33  ;;  %v2427_v40 = vpop.f32.mrb[2].mxu1 }
 0x365   : > { %v2432_v42 = vmax.f32 %v3146_v37, 0.0  ;;  %v2428_v53 = vpop.f32.mrb[3].mxu1 }
 0x366   : > { %v2433_v45 = vmax.f32 %v3147_v12, 0.0 }
 0x367   : > { %v2436_v56 = vpack.c.bf16 %v2432_v42, %v2432_v42 }
 0x368   : > { %v2437_v46 = vpack.c.bf16 %v2433_v45, %v2433_v45 }
 0x36a   : > { %2773 = vmatprep.mubr.bf16.mxu1 %v2437_v46 }
 0x36b   : > { %2774 = vmatmul.mubr.bf16.vlgmr.msra.gmra.mrb[4].mxu1 %v2436_v56 }
 0x42b   : > { %v3116_v47 = vpop.f32.mrb[4].mxu0 }
 0x42c   : > { %v3117_v31 = vpop.f32.mrb[5].mxu0 }
 0x42d   : > { %v3118_v50 = vadd.f32 %v3117_v31, %v3116_v47  ;;  %v3119_v54 = vpop.f32.mrb[6].mxu0 }
 0x42e   : > { %v3120_v62 = vpop.f32.mrb[7].mxu0 }
 0x42f   : > { %v2736_v2 = vadd.f32 %v3118_v50, %v3062_v49 }
 0x43e   : > { %v3138_v48 = vpop.f32.mrb[4].mxu1 }
 0x43f   : > { %v3139_v57 = vpop.f32.mrb[5].mxu1 }
 0x440   : > { %v3140_v58 = vadd.f32 %v3139_v57, %v3138_v48  ;;  %v3141_v61 = vpop.f32.mrb[6].mxu1 }
 0x441   : > { %v3142_v63 = vpop.f32.mrb[7].mxu1 }
 0x442   : > { %v2776_v59 = vadd.f32 %v3140_v58, %v2736_v2 }
 0x444   : > { %2781 = vst [vmem:[#allocation11] sm:$0x3] %v2776_v59 }
 0x445 PF: > { %p3197_p13 = scmp.eq.s32.totalorder %s3770_s28, 1  ;;  %s3710_s13 = smov [#allocation11]  }
 0x446   : > { %s2789_s16 = sshll.u32 %s3710_s13, 4  ;;  %s2790_s16 = int_to_ptr.vmem [resolvable:$true] %s2789_s16 }
 0x447   : > { %s3620_s14 = scalar_lea.vmem %s2790_s16, 32  ;;  %p3627_p9 = scmp.lt.s32.totalorder %s2790_s16, %s2790_s16 }
 0x448   : > { %p3621_p1 = scmp.ne.s32.totalorder %s2790_s16, %s3620_s14  ;;  %p3628_p4 = scmp.lt.s32.totalorder %s3620_s14, %s3620_s14 }
 0x44a   : > { %p3622_p5 = pnand %p3621_p1, %p3197_p13  ;;  %p3629_p10 = por %p3628_p4, %p3627_p9 }
 0x44c   : > { %p3623_p8 = pneg %p3622_p5 }
 0x44e   : > { %p3630_p12 = pnand %p3629_p10, %p3623_p8 }
 0x450   : > { %3633 = shalt.err (!%p3630_p12)
}
 0x451   : > { %s3634_s18 = scalar_lea.hbm %s4212_s7, 32 }
 0x452   : > { %p3635_p0 = scmp.ne.s32.totalorder %s4212_s7, %s3634_s18  ;;  %p3640_p6 = scmp.lt.u32.totalorder %s3634_s18, %s4212_s7 }
 0x454   : > { %p3636_p2 = pnand %p3635_p0, %p3197_p13 }
 0x456   : > { %p3637_p3 = pneg %p3636_p2 }
 0x458   : > { %p3642_p7 = pnand %p3640_p6, %p3637_p3 }
 0x45a   : > { %3645 = shalt.err (!%p3642_p7)
}
 0x45b   : > { %3178 = dma.vmem_to_hbm [thread:$0]  (%p3197_p13), %s2790_s16, 32, %s4212_s7, [#allocation5]  }
 0x45c   : > { %3675 = dma.done.wait (%p3197_p13), [#allocation5], 32  }
 0x45d   : > { %3677 = vsyncadd (%p3197_p13), [#allocation5], 4294967264 }
 0x45e PF: > { %s4234_s27 = sld [smem:[#allocation19_spill]]  ;;  %s4235_s19 = sld [smem:[#allocation20_spill]] }
 0x45f   : > { %s4236_s24 = smov %s3684_s25  ;;  %s4237_s25 = smov %s3688_s26 }
 0x464   : > { %p20_p11 = scmp.ge.s32.totalorder %s4234_s27, 4   ;;  %s4238_s26 = smov %s4235_s19 }
 0x466   :  { %22 = sbr.rel (!%p20_p11) target bundleno = 6 (0x6), region = 110 }
 0x46d   :  { %2802 = vsyncpa [#allocation4], 1 }
 0x46e   :  { %2804 = vsyncpa [#allocation4 + $0x1], 1 }
 0x46f   :  { %2805 = vsyncpa [#allocation7], 1 }
 0x470   :  { %2806 = vsyncpa [#allocation10], 1 }
 0x471   :  { %2807 = vsyncpa [#allocation5], 1 }
 0x472   :  { %2809 = vsyncpa [#allocation5 + $0x1], 1 }

</bundles_post_ra>
